<compile_context>
chip_gen: v6e
topology: v6e:2x2x1
jax: 0.10.0
libtpu: 0.0.40
codegen_flags: <defaults>
</compile_context>

<pallas_src>
import functools

import jax
import jax.numpy as jnp
from jax import lax
from jax.experimental import pallas as pl
from jax.experimental.pallas import tpu as pltpu


def _ds_conv_kernel(x_ref, w_ref, bias_ref, o_ref, *, K, Ho, Wo, C, Nb, Cout):
    """One batch-block per grid step.

    x_ref   : (Nb, Hp, Wp, C)    padded NHWC input (un-replicated channels)
    w_ref   : (K, K, Cout, C)    folded depthwise*pointwise weights
    bias_ref: (Cout, 1)          folded bias
    o_ref   : (Nb, Cout, S)      S = Ho*Wo  (lane-dense output)
    """
    S = Ho * Wo
    out = jnp.zeros((Cout, Nb * S), jnp.float32)

    for kh in range(K):                       # static unrolled taps (K*K matmuls)
        for kw in range(K):
            win = x_ref[:, kh:kh + Ho, kw:kw + Wo, :]        # (Nb, Ho, Wo, C)
            # Leading-dim collapse only (Wo % 8 == 0 -> layout-compatible).
            win_flat = win.reshape(Nb * S, C)                # (Nb*S, C)
            # Contract the channel (lane) dim of both operands on the MXU:
            # (Cout, C) x (Nb*S, C) -> (Cout, Nb*S), lane-dense result.
            out = out + lax.dot_general(
                w_ref[kh, kw], win_flat,
                dimension_numbers=(((1,), (1,)), ((), ())),
                preferred_element_type=jnp.float32)

    out = out + bias_ref[...]                                # (Cout,1) lane bcast
    for b in range(Nb):                                      # aligned lane slices
        o_ref[b] = out[:, b * S:(b + 1) * S].astype(o_ref.dtype)


def depthwise_separable_conv(x_nchw, dw_w, dw_b, pw_w, pw_b,
                             *, kernel_size, padding, hidden_multiplier):
    """x_nchw: (N, C, H, W) f32.
    dw_w: (C*hm, 1, K, K)    dw_b: (C*hm,)
    pw_w: (Cout, C*hm, 1, 1) pw_b: (Cout,)
    Returns (N, Cout, Ho, Wo) matching nn.Conv2d(depthwise)->nn.Conv2d(1x1).
    """
    N, C, H, W = x_nchw.shape
    K = kernel_size
    hm = hidden_multiplier
    Cout = pw_w.shape[0]
    Ho = H + 2 * padding - K + 1
    Wo = W + 2 * padding - K + 1
    Hp, Wp = H + 2 * padding, W + 2 * padding
    S = Ho * Wo

    # --- layout plumbing (no channel replication in HBM) ---
    x_nhwc = jnp.transpose(x_nchw, (0, 2, 3, 1))                       # (N,H,W,C)
    x_pad = jnp.pad(x_nhwc, ((0, 0), (padding, padding),
                             (padding, padding), (0, 0)))              # (N,Hp,Wp,C)

    # --- exact weight folding (tiny tensors, done once in the wrapper) ---
    # PyTorch grouped conv: depthwise output channel c*hm + m reads input c.
    pw2 = pw_w[:, :, 0, 0]                                             # (Cout,Cmid)
    pw3 = pw2.reshape(Cout, C, hm)                                     # [o,c,m]
    dw3 = dw_w[:, 0].reshape(C, hm, K, K)                              # [c,m,kh,kw]
    # W_eff[kh,kw,o,c] = sum_m pw3[o,c,m] * dw3[c,m,kh,kw]
    w_eff = jnp.einsum('ocm,cmhw->hwoc', pw3, dw3)                     # (K,K,Cout,C)
    # Fold depthwise bias into the pointwise bias (exact, no nonlinearity).
    bias_eff = (pw_b + pw2 @ dw_b).reshape(Cout, 1)

    # Batch folding: smallest Nb dividing N with Nb*S >= 512 (else whole batch).
    Nb = N
    for d in range(1, N + 1):
        if N % d == 0 and d * S >= 512:
            Nb = d
            break
    grid = (N // Nb,)
    # TODO(synk): for N==1 on v7x, also tile Ho across the grid so both
    # TensorCores get work; not needed at these shapes.

    kernel = functools.partial(_ds_conv_kernel, K=K, Ho=Ho, Wo=Wo,
                               C=C, Nb=Nb, Cout=Cout)

    out_flat = pl.pallas_call(
        kernel,
        out_shape=jax.ShapeDtypeStruct((N, Cout, S), jnp.float32),
        grid_spec=pltpu.PrefetchScalarGridSpec(
            num_scalar_prefetch=0,
            grid=grid,
            in_specs=[
                pl.BlockSpec((Nb, Hp, Wp, C), lambda n: (n, 0, 0, 0)),
                pl.BlockSpec((K, K, Cout, C), lambda n: (0, 0, 0, 0)),
                pl.BlockSpec((Cout, 1), lambda n: (0, 0)),
            ],
            out_specs=pl.BlockSpec((Nb, Cout, S), lambda n: (n, 0, 0)),
        ),
        compiler_params=pltpu.CompilerParams(
            dimension_semantics=("parallel",)),
    )(x_pad, w_eff, bias_eff)

    # Lane-dense kernel output -> NCHW via a free reshape (no transpose).
    return out_flat.reshape(N, Cout, Ho, Wo)


def _reference(x, dw_w, dw_b, pw_w, pw_b, *, padding, groups):
    """Pure-JAX reference (lax conv) mirroring the PyTorch module."""
    dn = lax.conv_dimension_numbers(x.shape, dw_w.shape,
                                    ("NCHW", "OIHW", "NCHW"))
    y = lax.conv_general_dilated(x, dw_w, window_strides=(1, 1),
                                 padding=[(padding, padding)] * 2,
                                 dimension_numbers=dn,
                                 feature_group_count=groups)
    y = y + dw_b.reshape(1, -1, 1, 1)
    dn2 = lax.conv_dimension_numbers(y.shape, pw_w.shape,
                                     ("NCHW", "OIHW", "NCHW"))
    z = lax.conv_general_dilated(y, pw_w, window_strides=(1, 1),
                                 padding="VALID", dimension_numbers=dn2)
    return z + pw_b.reshape(1, -1, 1, 1)


if __name__ == "__main__":
    # Module config (small, consistent with the forward pass)
    N, C, H, W = 2, 4, 16, 16
    kernel_size, padding, hidden_multiplier = 3, 1, 2
    out_channels = 8
    Cmid = C * hidden_multiplier

    key = jax.random.PRNGKey(0)
    k1, k2, k3, k4, k5 = jax.random.split(key, 5)
    x = jax.random.normal(k1, (N, C, H, W), jnp.float32)
    dw_w = jax.random.normal(k2, (Cmid, 1, kernel_size, kernel_size),
                             jnp.float32) * 0.2
    dw_b = jax.random.normal(k3, (Cmid,), jnp.float32) * 0.1
    pw_w = jax.random.normal(k4, (out_channels, Cmid, 1, 1), jnp.float32) * 0.2
    pw_b = jax.random.normal(k5, (out_channels,), jnp.float32) * 0.1

    out = depthwise_separable_conv(
        x, dw_w, dw_b, pw_w, pw_b,
        kernel_size=kernel_size, padding=padding,
        hidden_multiplier=hidden_multiplier)
    out = jax.block_until_ready(out)

    ref = _reference(x, dw_w, dw_b, pw_w, pw_b, padding=padding, groups=C)
    assert out.shape == ref.shape == (N, out_channels, H, W)
    assert jnp.allclose(out, ref, atol=1e-4, rtol=1e-4)

    print("KERNEL_OK")
</pallas_src>

<mosaic_0001>
module attributes {stable_mosaic.version = 11 : i64} {
  func.func @_ds_conv_kernel(%arg0: i32, %arg1: memref<2x18x18x4xf32, #tpu.memory_space<vmem>>, %arg2: memref<3x3x8x4xf32, #tpu.memory_space<vmem>>, %arg3: memref<8x1xf32, #tpu.memory_space<vmem>>, %arg4: memref<2x8x256xf32, #tpu.memory_space<vmem>>) attributes {dimension_semantics = [#tpu.dimension_semantics<parallel>], iteration_bounds = array<i64: 1>, scalar_prefetch = 0 : i64, scratch_operands = 0 : i64, tpu.core_type = #tpu.core_type<tc>, window_params = [{transform_indices = @transform_0, window_bounds = array<i64: 2, 18, 18, 4>}, {pipeline_mode = #tpu.pipeline_mode<synchronous>, transform_indices = @transform_1, window_bounds = array<i64: 3, 3, 8, 4>}, {pipeline_mode = #tpu.pipeline_mode<synchronous>, transform_indices = @transform_2, window_bounds = array<i64: 8, 1>}, {transform_indices = @transform_3, window_bounds = array<i64: 2, 8, 256>}]} {
    %cst = arith.constant 0.000000e+00 : f32
    %0 = vector.broadcast %cst : f32 to vector<8x512xf32>
    %c0 = arith.constant 0 : index
    %c0_0 = arith.constant 0 : index
    %c0_1 = arith.constant 0 : index
    %c0_2 = arith.constant 0 : index
    %1 = vector.load %arg1[%c0, %c0_0, %c0_1, %c0_2] : memref<2x18x18x4xf32, #tpu.memory_space<vmem>>, vector<2x16x16x4xf32>
    %2 = vector.shape_cast %1 : vector<2x16x16x4xf32> to vector<512x4xf32>
    %c0_3 = arith.constant 0 : index
    %c0_4 = arith.constant 0 : index
    %c0_5 = arith.constant 0 : index
    %c0_6 = arith.constant 0 : index
    %3 = vector.load %arg2[%c0_3, %c0_4, %c0_5, %c0_6] : memref<3x3x8x4xf32, #tpu.memory_space<vmem>>, vector<1x1x8x4xf32>
    %4 = vector.shape_cast %3 : vector<1x1x8x4xf32> to vector<8x4xf32>
    %cst_7 = arith.constant dense<0.000000e+00> : vector<8x512xf32>
    %5 = tpu.matmul %4, %2, %cst_7 {dimension_numbers = #tpu.dot_dimension_numbers<[1], [1], [0], [0], [0, 0, 1, 0], [], []>} : vector<8x4xf32>, vector<512x4xf32>, vector<8x512xf32> -> vector<8x512xf32>
    %6 = arith.addf %0, %5 : vector<8x512xf32>
    %c0_8 = arith.constant 0 : index
    %c0_9 = arith.constant 0 : index
    %c1 = arith.constant 1 : index
    %c0_10 = arith.constant 0 : index
    %7 = vector.load %arg1[%c0_8, %c0_9, %c1, %c0_10] : memref<2x18x18x4xf32, #tpu.memory_space<vmem>>, vector<2x16x16x4xf32>
    %8 = vector.shape_cast %7 : vector<2x16x16x4xf32> to vector<512x4xf32>
    %c0_11 = arith.constant 0 : index
    %c1_12 = arith.constant 1 : index
    %c0_13 = arith.constant 0 : index
    %c0_14 = arith.constant 0 : index
    %9 = vector.load %arg2[%c0_11, %c1_12, %c0_13, %c0_14] : memref<3x3x8x4xf32, #tpu.memory_space<vmem>>, vector<1x1x8x4xf32>
    %10 = vector.shape_cast %9 : vector<1x1x8x4xf32> to vector<8x4xf32>
    %cst_15 = arith.constant dense<0.000000e+00> : vector<8x512xf32>
    %11 = tpu.matmul %10, %8, %cst_15 {dimension_numbers = #tpu.dot_dimension_numbers<[1], [1], [0], [0], [0, 0, 1, 0], [], []>} : vector<8x4xf32>, vector<512x4xf32>, vector<8x512xf32> -> vector<8x512xf32>
    %12 = arith.addf %6, %11 : vector<8x512xf32>
    %c0_16 = arith.constant 0 : index
    %c0_17 = arith.constant 0 : index
    %c2 = arith.constant 2 : index
    %c0_18 = arith.constant 0 : index
    %13 = vector.load %arg1[%c0_16, %c0_17, %c2, %c0_18] : memref<2x18x18x4xf32, #tpu.memory_space<vmem>>, vector<2x16x16x4xf32>
    %14 = vector.shape_cast %13 : vector<2x16x16x4xf32> to vector<512x4xf32>
    %c0_19 = arith.constant 0 : index
    %c2_20 = arith.constant 2 : index
    %c0_21 = arith.constant 0 : index
    %c0_22 = arith.constant 0 : index
    %15 = vector.load %arg2[%c0_19, %c2_20, %c0_21, %c0_22] : memref<3x3x8x4xf32, #tpu.memory_space<vmem>>, vector<1x1x8x4xf32>
    %16 = vector.shape_cast %15 : vector<1x1x8x4xf32> to vector<8x4xf32>
    %cst_23 = arith.constant dense<0.000000e+00> : vector<8x512xf32>
    %17 = tpu.matmul %16, %14, %cst_23 {dimension_numbers = #tpu.dot_dimension_numbers<[1], [1], [0], [0], [0, 0, 1, 0], [], []>} : vector<8x4xf32>, vector<512x4xf32>, vector<8x512xf32> -> vector<8x512xf32>
    %18 = arith.addf %12, %17 : vector<8x512xf32>
    %c0_24 = arith.constant 0 : index
    %c1_25 = arith.constant 1 : index
    %c0_26 = arith.constant 0 : index
    %c0_27 = arith.constant 0 : index
    %19 = vector.load %arg1[%c0_24, %c1_25, %c0_26, %c0_27] : memref<2x18x18x4xf32, #tpu.memory_space<vmem>>, vector<2x16x16x4xf32>
    %20 = vector.shape_cast %19 : vector<2x16x16x4xf32> to vector<512x4xf32>
    %c1_28 = arith.constant 1 : index
    %c0_29 = arith.constant 0 : index
    %c0_30 = arith.constant 0 : index
    %c0_31 = arith.constant 0 : index
    %21 = vector.load %arg2[%c1_28, %c0_29, %c0_30, %c0_31] : memref<3x3x8x4xf32, #tpu.memory_space<vmem>>, vector<1x1x8x4xf32>
    %22 = vector.shape_cast %21 : vector<1x1x8x4xf32> to vector<8x4xf32>
    %cst_32 = arith.constant dense<0.000000e+00> : vector<8x512xf32>
    %23 = tpu.matmul %22, %20, %cst_32 {dimension_numbers = #tpu.dot_dimension_numbers<[1], [1], [0], [0], [0, 0, 1, 0], [], []>} : vector<8x4xf32>, vector<512x4xf32>, vector<8x512xf32> -> vector<8x512xf32>
    %24 = arith.addf %18, %23 : vector<8x512xf32>
    %c0_33 = arith.constant 0 : index
    %c1_34 = arith.constant 1 : index
    %c1_35 = arith.constant 1 : index
    %c0_36 = arith.constant 0 : index
    %25 = vector.load %arg1[%c0_33, %c1_34, %c1_35, %c0_36] : memref<2x18x18x4xf32, #tpu.memory_space<vmem>>, vector<2x16x16x4xf32>
    %26 = vector.shape_cast %25 : vector<2x16x16x4xf32> to vector<512x4xf32>
    %c1_37 = arith.constant 1 : index
    %c1_38 = arith.constant 1 : index
    %c0_39 = arith.constant 0 : index
    %c0_40 = arith.constant 0 : index
    %27 = vector.load %arg2[%c1_37, %c1_38, %c0_39, %c0_40] : memref<3x3x8x4xf32, #tpu.memory_space<vmem>>, vector<1x1x8x4xf32>
    %28 = vector.shape_cast %27 : vector<1x1x8x4xf32> to vector<8x4xf32>
    %cst_41 = arith.constant dense<0.000000e+00> : vector<8x512xf32>
    %29 = tpu.matmul %28, %26, %cst_41 {dimension_numbers = #tpu.dot_dimension_numbers<[1], [1], [0], [0], [0, 0, 1, 0], [], []>} : vector<8x4xf32>, vector<512x4xf32>, vector<8x512xf32> -> vector<8x512xf32>
    %30 = arith.addf %24, %29 : vector<8x512xf32>
    %c0_42 = arith.constant 0 : index
    %c1_43 = arith.constant 1 : index
    %c2_44 = arith.constant 2 : index
    %c0_45 = arith.constant 0 : index
    %31 = vector.load %arg1[%c0_42, %c1_43, %c2_44, %c0_45] : memref<2x18x18x4xf32, #tpu.memory_space<vmem>>, vector<2x16x16x4xf32>
    %32 = vector.shape_cast %31 : vector<2x16x16x4xf32> to vector<512x4xf32>
    %c1_46 = arith.constant 1 : index
    %c2_47 = arith.constant 2 : index
    %c0_48 = arith.constant 0 : index
    %c0_49 = arith.constant 0 : index
    %33 = vector.load %arg2[%c1_46, %c2_47, %c0_48, %c0_49] : memref<3x3x8x4xf32, #tpu.memory_space<vmem>>, vector<1x1x8x4xf32>
    %34 = vector.shape_cast %33 : vector<1x1x8x4xf32> to vector<8x4xf32>
    %cst_50 = arith.constant dense<0.000000e+00> : vector<8x512xf32>
    %35 = tpu.matmul %34, %32, %cst_50 {dimension_numbers = #tpu.dot_dimension_numbers<[1], [1], [0], [0], [0, 0, 1, 0], [], []>} : vector<8x4xf32>, vector<512x4xf32>, vector<8x512xf32> -> vector<8x512xf32>
    %36 = arith.addf %30, %35 : vector<8x512xf32>
    %c0_51 = arith.constant 0 : index
    %c2_52 = arith.constant 2 : index
    %c0_53 = arith.constant 0 : index
    %c0_54 = arith.constant 0 : index
    %37 = vector.load %arg1[%c0_51, %c2_52, %c0_53, %c0_54] : memref<2x18x18x4xf32, #tpu.memory_space<vmem>>, vector<2x16x16x4xf32>
    %38 = vector.shape_cast %37 : vector<2x16x16x4xf32> to vector<512x4xf32>
    %c2_55 = arith.constant 2 : index
    %c0_56 = arith.constant 0 : index
    %c0_57 = arith.constant 0 : index
    %c0_58 = arith.constant 0 : index
    %39 = vector.load %arg2[%c2_55, %c0_56, %c0_57, %c0_58] : memref<3x3x8x4xf32, #tpu.memory_space<vmem>>, vector<1x1x8x4xf32>
    %40 = vector.shape_cast %39 : vector<1x1x8x4xf32> to vector<8x4xf32>
    %cst_59 = arith.constant dense<0.000000e+00> : vector<8x512xf32>
    %41 = tpu.matmul %40, %38, %cst_59 {dimension_numbers = #tpu.dot_dimension_numbers<[1], [1], [0], [0], [0, 0, 1, 0], [], []>} : vector<8x4xf32>, vector<512x4xf32>, vector<8x512xf32> -> vector<8x512xf32>
    %42 = arith.addf %36, %41 : vector<8x512xf32>
    %c0_60 = arith.constant 0 : index
    %c2_61 = arith.constant 2 : index
    %c1_62 = arith.constant 1 : index
    %c0_63 = arith.constant 0 : index
    %43 = vector.load %arg1[%c0_60, %c2_61, %c1_62, %c0_63] : memref<2x18x18x4xf32, #tpu.memory_space<vmem>>, vector<2x16x16x4xf32>
    %44 = vector.shape_cast %43 : vector<2x16x16x4xf32> to vector<512x4xf32>
    %c2_64 = arith.constant 2 : index
    %c1_65 = arith.constant 1 : index
    %c0_66 = arith.constant 0 : index
    %c0_67 = arith.constant 0 : index
    %45 = vector.load %arg2[%c2_64, %c1_65, %c0_66, %c0_67] : memref<3x3x8x4xf32, #tpu.memory_space<vmem>>, vector<1x1x8x4xf32>
    %46 = vector.shape_cast %45 : vector<1x1x8x4xf32> to vector<8x4xf32>
    %cst_68 = arith.constant dense<0.000000e+00> : vector<8x512xf32>
    %47 = tpu.matmul %46, %44, %cst_68 {dimension_numbers = #tpu.dot_dimension_numbers<[1], [1], [0], [0], [0, 0, 1, 0], [], []>} : vector<8x4xf32>, vector<512x4xf32>, vector<8x512xf32> -> vector<8x512xf32>
    %48 = arith.addf %42, %47 : vector<8x512xf32>
    %c0_69 = arith.constant 0 : index
    %c2_70 = arith.constant 2 : index
    %c2_71 = arith.constant 2 : index
    %c0_72 = arith.constant 0 : index
    %49 = vector.load %arg1[%c0_69, %c2_70, %c2_71, %c0_72] : memref<2x18x18x4xf32, #tpu.memory_space<vmem>>, vector<2x16x16x4xf32>
    %50 = vector.shape_cast %49 : vector<2x16x16x4xf32> to vector<512x4xf32>
    %c2_73 = arith.constant 2 : index
    %c2_74 = arith.constant 2 : index
    %c0_75 = arith.constant 0 : index
    %c0_76 = arith.constant 0 : index
    %51 = vector.load %arg2[%c2_73, %c2_74, %c0_75, %c0_76] : memref<3x3x8x4xf32, #tpu.memory_space<vmem>>, vector<1x1x8x4xf32>
    %52 = vector.shape_cast %51 : vector<1x1x8x4xf32> to vector<8x4xf32>
    %cst_77 = arith.constant dense<0.000000e+00> : vector<8x512xf32>
    %53 = tpu.matmul %52, %50, %cst_77 {dimension_numbers = #tpu.dot_dimension_numbers<[1], [1], [0], [0], [0, 0, 1, 0], [], []>} : vector<8x4xf32>, vector<512x4xf32>, vector<8x512xf32> -> vector<8x512xf32>
    %54 = arith.addf %48, %53 : vector<8x512xf32>
    %c0_78 = arith.constant 0 : index
    %c0_79 = arith.constant 0 : index
    %55 = vector.load %arg3[%c0_78, %c0_79] : memref<8x1xf32, #tpu.memory_space<vmem>>, vector<8x1xf32>
    %56 = vector.broadcast %55 : vector<8x1xf32> to vector<8x512xf32>
    %57 = arith.addf %54, %56 : vector<8x512xf32>
    %58 = vector.extract_strided_slice %57 {offsets = [0, 0], sizes = [8, 256], strides = [1, 1]} : vector<8x512xf32> to vector<8x256xf32>
    %c0_80 = arith.constant 0 : index
    %c0_81 = arith.constant 0 : index
    %c0_82 = arith.constant 0 : index
    %59 = vector.load %arg4[%c0_80, %c0_81, %c0_82] : memref<2x8x256xf32, #tpu.memory_space<vmem>>, vector<1x8x256xf32>
    %60 = vector.shape_cast %59 : vector<1x8x256xf32> to vector<8x256xf32>
    %61 = vector.shape_cast %58 : vector<8x256xf32> to vector<1x8x256xf32>
    tpu.vector_store %arg4[%c0_80, %c0_81, %c0_82], %61 {strides = array<i32>} : memref<2x8x256xf32, #tpu.memory_space<vmem>>, vector<1x8x256xf32>,
    %62 = vector.extract_strided_slice %57 {offsets = [0, 256], sizes = [8, 256], strides = [1, 1]} : vector<8x512xf32> to vector<8x256xf32>
    %c1_83 = arith.constant 1 : index
    %c0_84 = arith.constant 0 : index
    %c0_85 = arith.constant 0 : index
    %63 = vector.load %arg4[%c1_83, %c0_84, %c0_85] : memref<2x8x256xf32, #tpu.memory_space<vmem>>, vector<1x8x256xf32>
    %64 = vector.shape_cast %63 : vector<1x8x256xf32> to vector<8x256xf32>
    %65 = vector.shape_cast %62 : vector<8x256xf32> to vector<1x8x256xf32>
    tpu.vector_store %arg4[%c1_83, %c0_84, %c0_85], %65 {strides = array<i32>} : memref<2x8x256xf32, #tpu.memory_space<vmem>>, vector<1x8x256xf32>,
    return
  }
  func.func @transform_0(%arg0: i32) -> (i32, i32, i32, i32) {
    %c0_i32 = arith.constant 0 : i32
    %c0_i32_0 = arith.constant 0 : i32
    %c0_i32_1 = arith.constant 0 : i32
    %c0_i32_2 = arith.constant 0 : i32
    return %arg0, %c0_i32, %c0_i32_0, %c0_i32_1 : i32, i32, i32, i32
  }
  func.func @transform_1(%arg0: i32) -> (i32, i32, i32, i32) {
    %c0_i32 = arith.constant 0 : i32
    %c0_i32_0 = arith.constant 0 : i32
    %c0_i32_1 = arith.constant 0 : i32
    %c0_i32_2 = arith.constant 0 : i32
    %c0_i32_3 = arith.constant 0 : i32
    return %c0_i32, %c0_i32_0, %c0_i32_1, %c0_i32_2 : i32, i32, i32, i32
  }
  func.func @transform_2(%arg0: i32) -> (i32, i32) {
    %c0_i32 = arith.constant 0 : i32
    %c0_i32_0 = arith.constant 0 : i32
    %c0_i32_1 = arith.constant 0 : i32
    return %c0_i32, %c0_i32_0 : i32, i32
  }
  func.func @transform_3(%arg0: i32) -> (i32, i32, i32) {
    %c0_i32 = arith.constant 0 : i32
    %c0_i32_0 = arith.constant 0 : i32
    %c0_i32_1 = arith.constant 0 : i32
    return %arg0, %c0_i32, %c0_i32_0 : i32, i32, i32
  }
}

</mosaic_0001>

<bundles_post_ra>
// kernel: tpu_custom_call.1
= control target key start
LH: loop header
LB: loop body
LE: loop exit
PB: predicated region body
PF: predicated region fallthrough
CT: control target
= control target key end

     0   :  { %vm146_vm0 = vcmask 31744   ;;  %s7967_s0 = inlined_call_operand.vmem [shape: f32[2,18,18,4], index: 0, kind: input, shape index: {}]   ;;  %s7968_s1 = inlined_call_operand.vmem [shape: f32[3,3,8,4], index: 1, kind: input, shape index: {}]   ;;  %s7969_s2 = inlined_call_operand.vmem [shape: f32[8,1], index: 2, kind: input, shape index: {}]   ;;  %s7970_s3 = inlined_call_operand.hbm [shape: f32[2,8,256], index: 3, kind: output, shape index: {}]  }
   0x1   :  { %v111_v0 = vld [vmem:[%s7967_s0 + $0x171] sm:$0xff]  ;;  %v143_v1 = vld [vmem:[%s7967_s0 + $0x321] sm:$0xff]  ;;  %v110_v4 = vld [vmem:[%s7967_s0 + $0x169] sm:$0xff] }
   0x2   :  { %v95_v2 = vld [vmem:[%s7967_s0 + $0xb1] sm:$0xff]  ;;  %4689 = vmatprep.subr.msk.mxu0 %vm146_vm0, %v111_v0  ;;  %4723 = vmatprep.subr.msk.mxu1 %vm146_vm0, %v143_v1  ;;  %v127_v3 = vld [vmem:[%s7967_s0 + $0x261] sm:$0xff]  ;;  %v142_v5 = vld [vmem:[%s7967_s0 + $0x319] sm:$0xff] }
   0x3   :  { %4690 = vmatpush3.xpose.msk.msra.mxu0 %vm146_vm0, %v95_v2  ;;  %4724 = vmatpush3.xpose.msk.msra.mxu1 %vm146_vm0, %v127_v3  ;;  %v94_v6 = vld [vmem:[%s7967_s0 + $0xa9] sm:$0xff]  ;;  %v126_v7 = vld [vmem:[%s7967_s0 + $0x259] sm:$0xff]  ;;  %v108_v12 = vld [vmem:[%s7967_s0 + $0x151] sm:$0xff] }
   0x4   :  { %4691 = vmatprep.subr.msk.mxu0 %vm146_vm0, %v110_v4  ;;  %4725 = vmatprep.subr.msk.mxu1 %vm146_vm0, %v142_v5  ;;  %v109_v8 = vld [vmem:[%s7967_s0 + $0x159] sm:$0xff]  ;;  %v141_v9 = vld [vmem:[%s7967_s0 + $0x309] sm:$0xff]  ;;  %v140_v13 = vld [vmem:[%s7967_s0 + $0x301] sm:$0xff] }
   0x5   :  { %v93_v10 = vld [vmem:[%s7967_s0 + $0x99] sm:$0xff]  ;;  %v125_v11 = vld [vmem:[%s7967_s0 + $0x249] sm:$0xff]  ;;  %v92_v14 = vld [vmem:[%s7967_s0 + $0x91] sm:$0xff] }
   0x6   :  { %v124_v15 = vld [vmem:[%s7967_s0 + $0x241] sm:$0xff]  ;;  %v139_v17 = vld [vmem:[%s7967_s0 + $0x2f1] sm:$0xff]  ;;  %v106_v20 = vld [vmem:[%s7967_s0 + $0x139] sm:$0xff] }
   0x7   :  { %4692 = vmatpush3.xpose.msk.msra.mxu0 %vm146_vm0, %v94_v6  ;;  %4726 = vmatpush3.xpose.msk.msra.mxu1 %vm146_vm0, %v126_v7  ;;  %v107_v16 = vld [vmem:[%s7967_s0 + $0x141] sm:$0xff]  ;;  %v123_v19 = vld [vmem:[%s7967_s0 + $0x231] sm:$0xff]  ;;  %v138_v21 = vld [vmem:[%s7967_s0 + $0x2e9] sm:$0xff] }
   0x8   :  { %4693 = vmatprep.subr.msk.mxu0 %vm146_vm0, %v109_v8  ;;  %4727 = vmatprep.subr.msk.mxu1 %vm146_vm0, %v141_v9  ;;  %v91_v18 = vld [vmem:[%s7967_s0 + $0x81] sm:$0xff]  ;;  %v90_v22 = vld [vmem:[%s7967_s0 + $0x79] sm:$0xff]  ;;  %v122_v23 = vld [vmem:[%s7967_s0 + $0x229] sm:$0xff] }
   0x9   :  { %v105_v24 = vld [vmem:[%s7967_s0 + $0x129] sm:$0xff]  ;;  %v137_v25 = vld [vmem:[%s7967_s0 + $0x2d9] sm:$0xff]  ;;  %v104_v29 = vld [vmem:[%s7967_s0 + $0x121] sm:$0xff] }
   0xa   :  { %v5455_v26 = vld [vmem:[%s7968_s1 + $0x8] sm:$0xff]  ;;  %v121_v28 = vld [vmem:[%s7967_s0 + $0x219] sm:$0xff]  ;;  %v136_v30 = vld [vmem:[%s7967_s0 + $0x2d1] sm:$0xff] }
   0xb   :  { %4694 = vmatpush3.xpose.msk.msra.mxu0 %vm146_vm0, %v93_v10  ;;  %4728 = vmatpush3.xpose.msk.msra.mxu1 %vm146_vm0, %v125_v11  ;;  %v89_v27 = vld [vmem:[%s7967_s0 + $0x69] sm:$0xff]  ;;  %v88_v31 = vld [vmem:[%s7967_s0 + $0x61] sm:$0xff]  ;;  %v120_v32 = vld [vmem:[%s7967_s0 + $0x211] sm:$0xff] }
   0xc   :  { %4695 = vmatprep.subr.msk.mxu0 %vm146_vm0, %v108_v12  ;;  %4729 = vmatprep.subr.msk.mxu1 %vm146_vm0, %v140_v13  ;;  %v103_v33 = vld [vmem:[%s7967_s0 + $0x111] sm:$0xff]  ;;  %v135_v34 = vld [vmem:[%s7967_s0 + $0x2c1] sm:$0xff]  ;;  %v102_v37 = vld [vmem:[%s7967_s0 + $0x109] sm:$0xff] }
   0xd   :  { %4721 = vmatprep.mubr.msk.f32.mxu0 %vm146_vm0, %v5455_v26  ;;  %4755 = vmatprep.mubr.msk.f32.mxu1 %vm146_vm0, %v5455_v26  ;;  %v87_v35 = vld [vmem:[%s7967_s0 + $0x51] sm:$0xff]  ;;  %v119_v36 = vld [vmem:[%s7967_s0 + $0x201] sm:$0xff]  ;;  %v134_v38 = vld [vmem:[%s7967_s0 + $0x2b9] sm:$0xff] }
   0xe   :  { %v86_v39 = vld [vmem:[%s7967_s0 + $0x49] sm:$0xff]  ;;  %v118_v40 = vld [vmem:[%s7967_s0 + $0x1f9] sm:$0xff]  ;;  %v100_v45 = vld [vmem:[%s7967_s0 + $0xf1] sm:$0xff] }
   0xf   :  { %4696 = vmatpush3.xpose.msk.msra.mxu0 %vm146_vm0, %v92_v14  ;;  %4730 = vmatpush3.xpose.msk.msra.mxu1 %vm146_vm0, %v124_v15  ;;  %v101_v41 = vld [vmem:[%s7967_s0 + $0xf9] sm:$0xff]  ;;  %v133_v42 = vld [vmem:[%s7967_s0 + $0x2a9] sm:$0xff]  ;;  %v132_v46 = vld [vmem:[%s7967_s0 + $0x2a1] sm:$0xff] }
  0x10   :  { %4697 = vmatprep.subr.msk.mxu0 %vm146_vm0, %v107_v16  ;;  %4731 = vmatprep.subr.msk.mxu1 %vm146_vm0, %v139_v17  ;;  %v85_v43 = vld [vmem:[%s7967_s0 + $0x39] sm:$0xff]  ;;  %v117_v44 = vld [vmem:[%s7967_s0 + $0x1e9] sm:$0xff]  ;;  %v84_v47 = vld [vmem:[%s7967_s0 + $0x31] sm:$0xff] }
  0x11   :  { %v116_v48 = vld [vmem:[%s7967_s0 + $0x1e1] sm:$0xff]  ;;  %v131_v50 = vld [vmem:[%s7967_s0 + $0x291] sm:$0xff]  ;;  %v98_v53 = vld [vmem:[%s7967_s0 + $0xd9] sm:$0xff] }
  0x12   :  { %v99_v49 = vld [vmem:[%s7967_s0 + $0xe1] sm:$0xff]  ;;  %v115_v52 = vld [vmem:[%s7967_s0 + $0x1d1] sm:$0xff]  ;;  %v130_v54 = vld [vmem:[%s7967_s0 + $0x289] sm:$0xff] }
  0x13   :  { %4698 = vmatpush3.xpose.msk.msra.mxu0 %vm146_vm0, %v91_v18  ;;  %4732 = vmatpush3.xpose.msk.msra.mxu1 %vm146_vm0, %v123_v19  ;;  %v83_v51 = vld [vmem:[%s7967_s0 + $0x21] sm:$0xff]  ;;  %v82_v55 = vld [vmem:[%s7967_s0 + $0x19] sm:$0xff]  ;;  %v114_v56 = vld [vmem:[%s7967_s0 + $0x1c9] sm:$0xff] }
  0x14   :  { %4699 = vmatprep.subr.msk.mxu0 %vm146_vm0, %v106_v20  ;;  %4733 = vmatprep.subr.msk.mxu1 %vm146_vm0, %v138_v21  ;;  %v5586_v57 = vld [vmem:[%s7967_s0 + $0xc9] sm:$0xff]  ;;  %v5591_v58 = vld [vmem:[%s7967_s0 + $0x279] sm:$0xff]  ;;  %v5608_v61 = vld [vmem:[%s7967_s0 + $0xc1] sm:$0xff] }
  0x15   :  { %8047 = vst [vmem:[#allocation5_spill] sm:$0xff] %v5586_v57  ;;  %8048 = vst [vmem:[#allocation6_spill] sm:$0xff] %v5591_v58  ;;  %v81_v59 = vld [vmem:[%s7967_s0 + $0x9] sm:$0xff]  ;;  %v113_v60 = vld [vmem:[%s7967_s0 + $0x1b9] sm:$0xff] }
  0x16   :  { %8049 = vst [vmem:[#allocation7_spill] sm:$0xff] %v5608_v61  ;;  %v5613_v62 = vld [vmem:[%s7967_s0 + $0x271] sm:$0xff]  ;;  %v80_v63 = vld [vmem:[%s7967_s0 + $0x1] sm:$0xff] }
  0x17   :  { %4700 = vmatpush3.xpose.msk.msra.mxu0 %vm146_vm0, %v90_v22  ;;  %4734 = vmatpush3.xpose.msk.msra.mxu1 %vm146_vm0, %v122_v23  ;;  %8050 = vst [vmem:[#allocation8_spill] sm:$0xff] %v5613_v62  ;;  %v112_v0 = vld [vmem:[%s7967_s0 + $0x1b1] sm:$0xff]  ;;  %v5635_v2 = vld [vmem:[%s7967_s0 + $0x320] sm:$0xff]  ;;  %v5656_v5 = vld [vmem:[%s7967_s0 + $0x168] sm:$0xff] }
  0x18   :  { %4701 = vmatprep.subr.msk.mxu0 %vm146_vm0, %v105_v24  ;;  %4735 = vmatprep.subr.msk.mxu1 %vm146_vm0, %v137_v25  ;;  %v5630_v1 = vld [vmem:[%s7967_s0 + $0x170] sm:$0xff]  ;;  %v5651_v4 = vld [vmem:[%s7967_s0 + $0x260] sm:$0xff]  ;;  %v5661_v6 = vld [vmem:[%s7967_s0 + $0x318] sm:$0xff] }
  0x19   :  { %v5646_v3 = vld [vmem:[%s7967_s0 + $0xb0] sm:$0xff]  ;;  %v5670_v7 = vld [vmem:[%s7968_s1] sm:$0xff] }
  0x1b   :  { %4702 = vmatpush3.xpose.msk.msra.mxu0 %vm146_vm0, %v89_v27  ;;  %4736 = vmatpush3.xpose.msk.msra.mxu1 %vm146_vm0, %v121_v28 }
  0x1c   :  { %4703 = vmatprep.subr.msk.mxu0 %vm146_vm0, %v104_v29  ;;  %4737 = vmatprep.subr.msk.mxu1 %vm146_vm0, %v136_v30 }
  0x1f   :  { %4704 = vmatpush3.xpose.msk.msra.mxu0 %vm146_vm0, %v88_v31  ;;  %4738 = vmatpush3.xpose.msk.msra.mxu1 %vm146_vm0, %v120_v32 }
  0x20   :  { %4705 = vmatprep.subr.msk.mxu0 %vm146_vm0, %v103_v33  ;;  %4739 = vmatprep.subr.msk.mxu1 %vm146_vm0, %v135_v34 }
  0x23   :  { %4706 = vmatpush3.xpose.msk.msra.mxu0 %vm146_vm0, %v87_v35  ;;  %4740 = vmatpush3.xpose.msk.msra.mxu1 %vm146_vm0, %v119_v36 }
  0x24   :  { %4707 = vmatprep.subr.msk.mxu0 %vm146_vm0, %v102_v37  ;;  %4741 = vmatprep.subr.msk.mxu1 %vm146_vm0, %v134_v38 }
  0x27   :  { %4708 = vmatpush3.xpose.msk.msra.mxu0 %vm146_vm0, %v86_v39  ;;  %4742 = vmatpush3.xpose.msk.msra.mxu1 %vm146_vm0, %v118_v40 }
  0x28   :  { %4709 = vmatprep.subr.msk.mxu0 %vm146_vm0, %v101_v41  ;;  %4743 = vmatprep.subr.msk.mxu1 %vm146_vm0, %v133_v42 }
  0x2b   :  { %4710 = vmatpush3.xpose.msk.msra.mxu0 %vm146_vm0, %v85_v43  ;;  %4744 = vmatpush3.xpose.msk.msra.mxu1 %vm146_vm0, %v117_v44 }
  0x2c   :  { %4711 = vmatprep.subr.msk.mxu0 %vm146_vm0, %v100_v45  ;;  %4745 = vmatprep.subr.msk.mxu1 %vm146_vm0, %v132_v46 }
  0x2f   :  { %4712 = vmatpush3.xpose.msk.msra.mxu0 %vm146_vm0, %v84_v47  ;;  %4746 = vmatpush3.xpose.msk.msra.mxu1 %vm146_vm0, %v116_v48 }
  0x30   :  { %4713 = vmatprep.subr.msk.mxu0 %vm146_vm0, %v99_v49  ;;  %4747 = vmatprep.subr.msk.mxu1 %vm146_vm0, %v131_v50 }
  0x33   :  { %4714 = vmatpush3.xpose.msk.msra.mxu0 %vm146_vm0, %v83_v51  ;;  %4748 = vmatpush3.xpose.msk.msra.mxu1 %vm146_vm0, %v115_v52 }
  0x34   :  { %4715 = vmatprep.subr.msk.mxu0 %vm146_vm0, %v98_v53  ;;  %4749 = vmatprep.subr.msk.mxu1 %vm146_vm0, %v130_v54 }
  0x37   :  { %4716 = vmatpush3.xpose.msk.msra.mxu0 %vm146_vm0, %v82_v55  ;;  %4750 = vmatpush3.xpose.msk.msra.mxu1 %vm146_vm0, %v114_v56 }
  0x38   :  { %4717 = vmatprep.subr.msk.mxu0 %vm146_vm0, %v5586_v57  ;;  %4751 = vmatprep.subr.msk.mxu1 %vm146_vm0, %v5591_v58 }
  0x3b   :  { %4718 = vmatpush3.xpose.msk.msra.mxu0 %vm146_vm0, %v81_v59  ;;  %4752 = vmatpush3.xpose.msk.msra.mxu1 %vm146_vm0, %v113_v60 }
  0x3c   :  { %4719 = vmatprep.subr.msk.mxu0 %vm146_vm0, %v5608_v61  ;;  %4753 = vmatprep.subr.msk.mxu1 %vm146_vm0, %v5613_v62 }
  0x3f   :  { %4720 = vmatpush3.xpose.msk.msra.mxu0 %vm146_vm0, %v80_v63  ;;  %4754 = vmatpush3.xpose.msk.msra.mxu1 %vm146_vm0, %v112_v0 }
  0x40   :  { %4757 = vmatprep.subr.msk.mxu0 %vm146_vm0, %v5630_v1  ;;  %4791 = vmatprep.subr.msk.mxu1 %vm146_vm0, %v5635_v2 }
  0x42   :  { %4722 = vmatmul.mubr.msk.f32.vlgmr.msra.gmra.mxu0 %vm146_vm0, %v5455_v26  ;;  %4756 = vmatmul.mubr.msk.f32.vlgmr.msra.gmra.mxu1 %vm146_vm0, %v5455_v26 }
  0x43   :  { %8 = vsyncpa [#allocation3], 0  ;;  %4758 = vmatpush3.xpose.msk.msra.mxu0 %vm146_vm0, %v5646_v3  ;;  %4792 = vmatpush3.xpose.msk.msra.mxu1 %vm146_vm0, %v5651_v4  ;;  %v5683_v8 = vld [vmem:[%s7967_s0 + $0xa8] sm:$0xff]  ;;  %v5688_v9 = vld [vmem:[%s7967_s0 + $0x258] sm:$0xff] }
  0x44   :  { %4759 = vmatprep.subr.msk.mxu0 %vm146_vm0, %v5656_v5  ;;  %4793 = vmatprep.subr.msk.mxu1 %vm146_vm0, %v5661_v6  ;;  %v5693_v10 = vld [vmem:[%s7967_s0 + $0x158] sm:$0xff]  ;;  %v5698_v11 = vld [vmem:[%s7967_s0 + $0x308] sm:$0xff]  ;;  %v5725_v14 = vld [vmem:[%s7967_s0 + $0x150] sm:$0xff] }
  0x45   :  { %4789 = vmatprep.mubr.msk.f32.mxu0 %vm146_vm0, %v5670_v7  ;;  %4823 = vmatprep.mubr.msk.f32.mxu1 %vm146_vm0, %v5670_v7  ;;  %v5715_v12 = vld [vmem:[%s7967_s0 + $0x98] sm:$0xff]  ;;  %v5720_v13 = vld [vmem:[%s7967_s0 + $0x248] sm:$0xff]  ;;  %v5730_v15 = vld [vmem:[%s7967_s0 + $0x300] sm:$0xff] }
  0x46   :  { %v5743_v16 = vld [vmem:[%s7967_s0 + $0x90] sm:$0xff]  ;;  %v5748_v17 = vld [vmem:[%s7967_s0 + $0x240] sm:$0xff]  ;;  %v5781_v22 = vld [vmem:[%s7967_s0 + $0x138] sm:$0xff] }
  0x47   :  { %4760 = vmatpush3.xpose.msk.msra.mxu0 %vm146_vm0, %v5683_v8  ;;  %4794 = vmatpush3.xpose.msk.msra.mxu1 %vm146_vm0, %v5688_v9  ;;  %v5753_v18 = vld [vmem:[%s7967_s0 + $0x140] sm:$0xff]  ;;  %v5758_v19 = vld [vmem:[%s7967_s0 + $0x2f0] sm:$0xff]  ;;  %v5786_v23 = vld [vmem:[%s7967_s0 + $0x2e8] sm:$0xff] }
  0x48   :  { %4761 = vmatprep.subr.msk.mxu0 %vm146_vm0, %v5693_v10  ;;  %4795 = vmatprep.subr.msk.mxu1 %vm146_vm0, %v5698_v11  ;;  %v5771_v20 = vld [vmem:[%s7967_s0 + $0x80] sm:$0xff]  ;;  %v5776_v21 = vld [vmem:[%s7967_s0 + $0x230] sm:$0xff]  ;;  %v5799_v24 = vld [vmem:[%s7967_s0 + $0x78] sm:$0xff] }
  0x49   :  { %v5804_v25 = vld [vmem:[%s7967_s0 + $0x228] sm:$0xff]  ;;  %v5814_v27 = vld [vmem:[%s7967_s0 + $0x2d8] sm:$0xff]  ;;  %v5837_v30 = vld [vmem:[%s7967_s0 + $0x120] sm:$0xff] }
  0x4a   :  { %v5809_v26 = vld [vmem:[%s7967_s0 + $0x128] sm:$0xff]  ;;  %v5832_v29 = vld [vmem:[%s7967_s0 + $0x218] sm:$0xff]  ;;  %v5842_v31 = vld [vmem:[%s7967_s0 + $0x2d0] sm:$0xff] }
  0x4b   :  { %4762 = vmatpush3.xpose.msk.msra.mxu0 %vm146_vm0, %v5715_v12  ;;  %4796 = vmatpush3.xpose.msk.msra.mxu1 %vm146_vm0, %v5720_v13  ;;  %v5827_v28 = vld [vmem:[%s7967_s0 + $0x68] sm:$0xff]  ;;  %v5855_v32 = vld [vmem:[%s7967_s0 + $0x60] sm:$0xff]  ;;  %v5860_v33 = vld [vmem:[%s7967_s0 + $0x210] sm:$0xff] }
  0x4c   :  { %4763 = vmatprep.subr.msk.mxu0 %vm146_vm0, %v5725_v14  ;;  %4797 = vmatprep.subr.msk.mxu1 %vm146_vm0, %v5730_v15  ;;  %v5865_v34 = vld [vmem:[%s7967_s0 + $0x110] sm:$0xff]  ;;  %v5870_v35 = vld [vmem:[%s7967_s0 + $0x2c0] sm:$0xff]  ;;  %v5893_v38 = vld [vmem:[%s7967_s0 + $0x108] sm:$0xff] }
  0x4d   :  { %v5883_v36 = vld [vmem:[%s7967_s0 + $0x50] sm:$0xff]  ;;  %v5888_v37 = vld [vmem:[%s7967_s0 + $0x200] sm:$0xff]  ;;  %v5898_v39 = vld [vmem:[%s7967_s0 + $0x2b8] sm:$0xff] }
  0x4e   :  { %v5911_v40 = vld [vmem:[%s7967_s0 + $0x48] sm:$0xff]  ;;  %v5916_v41 = vld [vmem:[%s7967_s0 + $0x1f8] sm:$0xff]  ;;  %v5949_v46 = vld [vmem:[%s7967_s0 + $0xf0] sm:$0xff] }
  0x4f   :  { %4764 = vmatpush3.xpose.msk.msra.mxu0 %vm146_vm0, %v5743_v16  ;;  %4798 = vmatpush3.xpose.msk.msra.mxu1 %vm146_vm0, %v5748_v17  ;;  %v5921_v42 = vld [vmem:[%s7967_s0 + $0xf8] sm:$0xff]  ;;  %v5926_v43 = vld [vmem:[%s7967_s0 + $0x2a8] sm:$0xff]  ;;  %v5954_v47 = vld [vmem:[%s7967_s0 + $0x2a0] sm:$0xff] }
  0x50   :  { %4765 = vmatprep.subr.msk.mxu0 %vm146_vm0, %v5753_v18  ;;  %4799 = vmatprep.subr.msk.mxu1 %vm146_vm0, %v5758_v19  ;;  %v5939_v44 = vld [vmem:[%s7967_s0 + $0x38] sm:$0xff]  ;;  %v5944_v45 = vld [vmem:[%s7967_s0 + $0x1e8] sm:$0xff]  ;;  %v5967_v48 = vld [vmem:[%s7967_s0 + $0x30] sm:$0xff] }
  0x51   :  { %v5972_v49 = vld [vmem:[%s7967_s0 + $0x1e0] sm:$0xff]  ;;  %v5982_v51 = vld [vmem:[%s7967_s0 + $0x290] sm:$0xff]  ;;  %v6005_v54 = vld [vmem:[%s7967_s0 + $0xd8] sm:$0xff] }
  0x52   :  { %v5977_v50 = vld [vmem:[%s7967_s0 + $0xe0] sm:$0xff]  ;;  %v6000_v53 = vld [vmem:[%s7967_s0 + $0x1d0] sm:$0xff]  ;;  %v6010_v55 = vld [vmem:[%s7967_s0 + $0x288] sm:$0xff] }
  0x53   :  { %4766 = vmatpush3.xpose.msk.msra.mxu0 %vm146_vm0, %v5771_v20  ;;  %4800 = vmatpush3.xpose.msk.msra.mxu1 %vm146_vm0, %v5776_v21  ;;  %v5995_v52 = vld [vmem:[%s7967_s0 + $0x20] sm:$0xff]  ;;  %8051 = vst [vmem:[#allocation9_spill] sm:$0xff] %v6010_v55  ;;  %v6023_v56 = vld [vmem:[%s7967_s0 + $0x18] sm:$0xff]  ;;  %v6028_v59 = vld [vmem:[%s7967_s0 + $0x1c8] sm:$0xff] }
  0x54   :  { %4767 = vmatprep.subr.msk.mxu0 %vm146_vm0, %v5781_v22  ;;  %4801 = vmatprep.subr.msk.mxu1 %vm146_vm0, %v5786_v23  ;;  %8052 = vst [vmem:[#allocation10_spill] sm:$0xff] %v6023_v56  ;;  %8053 = vst [vmem:[#allocation11_spill] sm:$0xff] %v6028_v59  ;;  %v6033_v60 = vld [vmem:[%s7967_s0 + $0xc8] sm:$0xff]  ;;  %v6038_v63 = vld [vmem:[%s7967_s0 + $0x278] sm:$0xff] }
  0x55   :  { %v16_v0 = vld [vmem:[%s7967_s0 + $0x8] sm:$0xff]  ;;  %v48_v62 = vld [vmem:[%s7967_s0 + $0x1b8] sm:$0xff]  ;;  %v6057_v61 = vld [vmem:[%s7967_s0 + $0xc0] sm:$0xff] }
  0x56   :  { %v6062_v58 = vld [vmem:[%s7967_s0 + $0x270] sm:$0xff]  ;;  %v15_v57 = vld [vmem:[%s7967_s0] sm:$0xff] }
  0x57   :  { %4768 = vmatpush3.xpose.msk.msra.mxu0 %vm146_vm0, %v5799_v24  ;;  %4802 = vmatpush3.xpose.msk.msra.mxu1 %vm146_vm0, %v5804_v25 }
  0x58   :  { %4769 = vmatprep.subr.msk.mxu0 %vm146_vm0, %v5809_v26  ;;  %4803 = vmatprep.subr.msk.mxu1 %vm146_vm0, %v5814_v27 }
  0x5b   :  { %4770 = vmatpush3.xpose.msk.msra.mxu0 %vm146_vm0, %v5827_v28  ;;  %4804 = vmatpush3.xpose.msk.msra.mxu1 %vm146_vm0, %v5832_v29 }
  0x5c   :  { %4771 = vmatprep.subr.msk.mxu0 %vm146_vm0, %v5837_v30  ;;  %4805 = vmatprep.subr.msk.mxu1 %vm146_vm0, %v5842_v31 }
  0x5f   :  { %4772 = vmatpush3.xpose.msk.msra.mxu0 %vm146_vm0, %v5855_v32  ;;  %4806 = vmatpush3.xpose.msk.msra.mxu1 %vm146_vm0, %v5860_v33 }
  0x60   :  { %4773 = vmatprep.subr.msk.mxu0 %vm146_vm0, %v5865_v34  ;;  %4807 = vmatprep.subr.msk.mxu1 %vm146_vm0, %v5870_v35 }
  0x63   :  { %4774 = vmatpush3.xpose.msk.msra.mxu0 %vm146_vm0, %v5883_v36  ;;  %4808 = vmatpush3.xpose.msk.msra.mxu1 %vm146_vm0, %v5888_v37 }
  0x64   :  { %4775 = vmatprep.subr.msk.mxu0 %vm146_vm0, %v5893_v38  ;;  %4809 = vmatprep.subr.msk.mxu1 %vm146_vm0, %v5898_v39 }
  0x67   :  { %4776 = vmatpush3.xpose.msk.msra.mxu0 %vm146_vm0, %v5911_v40  ;;  %4810 = vmatpush3.xpose.msk.msra.mxu1 %vm146_vm0, %v5916_v41 }
  0x68   :  { %4777 = vmatprep.subr.msk.mxu0 %vm146_vm0, %v5921_v42  ;;  %4811 = vmatprep.subr.msk.mxu1 %vm146_vm0, %v5926_v43 }
  0x6b   :  { %4778 = vmatpush3.xpose.msk.msra.mxu0 %vm146_vm0, %v5939_v44  ;;  %4812 = vmatpush3.xpose.msk.msra.mxu1 %vm146_vm0, %v5944_v45 }
  0x6c   :  { %4779 = vmatprep.subr.msk.mxu0 %vm146_vm0, %v5949_v46  ;;  %4813 = vmatprep.subr.msk.mxu1 %vm146_vm0, %v5954_v47 }
  0x6f   :  { %4780 = vmatpush3.xpose.msk.msra.mxu0 %vm146_vm0, %v5967_v48  ;;  %4814 = vmatpush3.xpose.msk.msra.mxu1 %vm146_vm0, %v5972_v49 }
  0x70   :  { %4781 = vmatprep.subr.msk.mxu0 %vm146_vm0, %v5977_v50  ;;  %4815 = vmatprep.subr.msk.mxu1 %vm146_vm0, %v5982_v51 }
  0x73   :  { %4782 = vmatpush3.xpose.msk.msra.mxu0 %vm146_vm0, %v5995_v52  ;;  %4816 = vmatpush3.xpose.msk.msra.mxu1 %vm146_vm0, %v6000_v53 }
  0x74   :  { %4783 = vmatprep.subr.msk.mxu0 %vm146_vm0, %v6005_v54  ;;  %4817 = vmatprep.subr.msk.mxu1 %vm146_vm0, %v6010_v55  ;;  %v6100_v55 = vld [vmem:[%s7967_s0 + $0x262] sm:$0xff] }
  0x75   :  { %8057 = vst [vmem:[#allocation15_spill] sm:$0xff] %v6100_v55 }
  0x77   :  { %4784 = vmatpush3.xpose.msk.msra.mxu0 %vm146_vm0, %v6023_v56  ;;  %4818 = vmatpush3.xpose.msk.msra.mxu1 %vm146_vm0, %v6028_v59  ;;  %v47_v59 = vld [vmem:[%s7967_s0 + $0x1b0] sm:$0xff] }
  0x78   :  { %4785 = vmatprep.subr.msk.mxu0 %vm146_vm0, %v6033_v60  ;;  %4819 = vmatprep.subr.msk.mxu1 %vm146_vm0, %v6038_v63  ;;  %v6095_v56 = vld [vmem:[%s7967_s0 + $0xb2] sm:$0xff] }
  0x79   :  { %8056 = vst [vmem:[#allocation14_spill] sm:$0xff] %v6095_v56 }
  0x7b   :  { %4786 = vmatpush3.xpose.msk.msra.mxu0 %vm146_vm0, %v16_v0  ;;  %4820 = vmatpush3.xpose.msk.msra.mxu1 %vm146_vm0, %v48_v62  ;;  %v6079_v0 = vld [vmem:[%s7967_s0 + $0x172] sm:$0xff]  ;;  %v6084_v62 = vld [vmem:[%s7967_s0 + $0x322] sm:$0xff] }
  0x7c   :  { %4787 = vmatprep.subr.msk.mxu0 %vm146_vm0, %v6057_v61  ;;  %4821 = vmatprep.subr.msk.mxu1 %vm146_vm0, %v6062_v58  ;;  %8054 = vst [vmem:[#allocation12_spill] sm:$0xff] %v6079_v0  ;;  %8055 = vst [vmem:[#allocation13_spill] sm:$0xff] %v6084_v62 }
  0x7f   :  { %4788 = vmatpush3.xpose.msk.msra.mxu0 %vm146_vm0, %v15_v57  ;;  %4822 = vmatpush3.xpose.msk.msra.mxu1 %vm146_vm0, %v47_v59  ;;  %v6105_v57 = vld [vmem:[%s7967_s0 + $0x16a] sm:$0xff]  ;;  %v6110_v59 = vld [vmem:[%s7967_s0 + $0x31a] sm:$0xff] }
  0x80   :  { %4825 = vmatprep.subr.msk.mxu0 %vm146_vm0, %v6079_v0  ;;  %4859 = vmatprep.subr.msk.mxu1 %vm146_vm0, %v6084_v62  ;;  %8058 = vst [vmem:[#allocation16_spill] sm:$0xff] %v6105_v57  ;;  %8059 = vst [vmem:[#allocation17_spill] sm:$0xff] %v6110_v59  ;;  %v6119_v62 = vld [vmem:[%s7968_s1 + $0x10] sm:$0xff]  ;;  %v6137_v0 = vld [vmem:[%s7967_s0 + $0x25a] sm:$0xff] }
  0x81   :  { %8061 = vst [vmem:[#allocation19_spill] sm:$0xff] %v6137_v0 }
  0x82   :  { %4790 = vmatmul.mubr.msk.f32.vlgmr.msra.gmra.mxu0 %vm146_vm0, %v5670_v7  ;;  %4824 = vmatmul.mubr.msk.f32.vlgmr.msra.gmra.mxu1 %vm146_vm0, %v5670_v7  ;;  %v6132_v7 = vld [vmem:[%s7967_s0 + $0xaa] sm:$0xff] }
  0x83   :  { %4826 = vmatpush3.xpose.msk.msra.mxu0 %vm146_vm0, %v6095_v56  ;;  %4860 = vmatpush3.xpose.msk.msra.mxu1 %vm146_vm0, %v6100_v55  ;;  %8060 = vst [vmem:[#allocation18_spill] sm:$0xff] %v6132_v7  ;;  %v6142_v55 = vld [vmem:[%s7967_s0 + $0x15a] sm:$0xff]  ;;  %v6169_v56 = vld [vmem:[%s7967_s0 + $0x24a] sm:$0xff] }
  0x84   :  { %4827 = vmatprep.subr.msk.mxu0 %vm146_vm0, %v6105_v57  ;;  %4861 = vmatprep.subr.msk.mxu1 %vm146_vm0, %v6110_v59  ;;  %8062 = vst [vmem:[#allocation20_spill] sm:$0xff] %v6142_v55  ;;  %v6147_v57 = vld [vmem:[%s7967_s0 + $0x30a] sm:$0xff]  ;;  %v6164_v59 = vld [vmem:[%s7967_s0 + $0x9a] sm:$0xff]  ;;  %8065 = vst [vmem:[#allocation23_spill] sm:$0xff] %v6169_v56 }
  0x85   :  { %8063 = vst [vmem:[#allocation21_spill] sm:$0xff] %v6147_v57  ;;  %4857 = vmatprep.mubr.msk.f32.mxu0 %vm146_vm0, %v6119_v62  ;;  %4891 = vmatprep.mubr.msk.f32.mxu1 %vm146_vm0, %v6119_v62  ;;  %8064 = vst [vmem:[#allocation22_spill] sm:$0xff] %v6164_v59 }
  0x87   :  { %4828 = vmatpush3.xpose.msk.msra.mxu0 %vm146_vm0, %v6132_v7  ;;  %4862 = vmatpush3.xpose.msk.msra.mxu1 %vm146_vm0, %v6137_v0  ;;  %v6174_v0 = vld [vmem:[%s7967_s0 + $0x152] sm:$0xff]  ;;  %v6197_v7 = vld [vmem:[%s7967_s0 + $0x242] sm:$0xff] }
  0x88   :  { %4829 = vmatprep.subr.msk.mxu0 %vm146_vm0, %v6142_v55  ;;  %4863 = vmatprep.subr.msk.mxu1 %vm146_vm0, %v6147_v57  ;;  %8066 = vst [vmem:[#allocation24_spill] sm:$0xff] %v6174_v0  ;;  %v6179_v55 = vld [vmem:[%s7967_s0 + $0x302] sm:$0xff]  ;;  %v6192_v57 = vld [vmem:[%s7967_s0 + $0x92] sm:$0xff]  ;;  %8069 = vst [vmem:[#allocation27_spill] sm:$0xff] %v6197_v7 }
  0x89   :  { %8067 = vst [vmem:[#allocation25_spill] sm:$0xff] %v6179_v55  ;;  %8068 = vst [vmem:[#allocation26_spill] sm:$0xff] %v6192_v57 }
  0x8b   :  { %4830 = vmatpush3.xpose.msk.msra.mxu0 %vm146_vm0, %v6164_v59  ;;  %4864 = vmatpush3.xpose.msk.msra.mxu1 %vm146_vm0, %v6169_v56  ;;  %v6202_v56 = vld [vmem:[%s7967_s0 + $0x142] sm:$0xff]  ;;  %v6225_v59 = vld [vmem:[%s7967_s0 + $0x232] sm:$0xff] }
  0x8c   :  { %4831 = vmatprep.subr.msk.mxu0 %vm146_vm0, %v6174_v0  ;;  %4865 = vmatprep.subr.msk.mxu1 %vm146_vm0, %v6179_v55  ;;  %8070 = vst [vmem:[#allocation28_spill] sm:$0xff] %v6202_v56  ;;  %v6207_v0 = vld [vmem:[%s7967_s0 + $0x2f2] sm:$0xff]  ;;  %v6220_v55 = vld [vmem:[%s7967_s0 + $0x82] sm:$0xff]  ;;  %8073 = vst [vmem:[#allocation31_spill] sm:$0xff] %v6225_v59 }
  0x8d   :  { %8071 = vst [vmem:[#allocation29_spill] sm:$0xff] %v6207_v0  ;;  %8072 = vst [vmem:[#allocation30_spill] sm:$0xff] %v6220_v55 }
  0x8f   :  { %4832 = vmatpush3.xpose.msk.msra.mxu0 %vm146_vm0, %v6192_v57  ;;  %4866 = vmatpush3.xpose.msk.msra.mxu1 %vm146_vm0, %v6197_v7  ;;  %v6230_v7 = vld [vmem:[%s7967_s0 + $0x13a] sm:$0xff]  ;;  %v6253_v57 = vld [vmem:[%s7967_s0 + $0x22a] sm:$0xff] }
  0x90   :  { %4833 = vmatprep.subr.msk.mxu0 %vm146_vm0, %v6202_v56  ;;  %4867 = vmatprep.subr.msk.mxu1 %vm146_vm0, %v6207_v0  ;;  %8074 = vst [vmem:[#allocation32_spill] sm:$0xff] %v6230_v7  ;;  %v6235_v56 = vld [vmem:[%s7967_s0 + $0x2ea] sm:$0xff]  ;;  %v6248_v0 = vld [vmem:[%s7967_s0 + $0x7a] sm:$0xff]  ;;  %8077 = vst [vmem:[#allocation35_spill] sm:$0xff] %v6253_v57 }
  0x91   :  { %8075 = vst [vmem:[#allocation33_spill] sm:$0xff] %v6235_v56  ;;  %8076 = vst [vmem:[#allocation34_spill] sm:$0xff] %v6248_v0 }
  0x93   :  { %4834 = vmatpush3.xpose.msk.msra.mxu0 %vm146_vm0, %v6220_v55  ;;  %4868 = vmatpush3.xpose.msk.msra.mxu1 %vm146_vm0, %v6225_v59  ;;  %v6258_v59 = vld [vmem:[%s7967_s0 + $0x12a] sm:$0xff]  ;;  %v6281_v55 = vld [vmem:[%s7967_s0 + $0x21a] sm:$0xff] }
  0x94   :  { %4835 = vmatprep.subr.msk.mxu0 %vm146_vm0, %v6230_v7  ;;  %4869 = vmatprep.subr.msk.mxu1 %vm146_vm0, %v6235_v56  ;;  %8078 = vst [vmem:[#allocation36_spill] sm:$0xff] %v6258_v59  ;;  %v6263_v7 = vld [vmem:[%s7967_s0 + $0x2da] sm:$0xff]  ;;  %v6276_v56 = vld [vmem:[%s7967_s0 + $0x6a] sm:$0xff]  ;;  %8081 = vst [vmem:[#allocation39_spill] sm:$0xff] %v6281_v55 }
  0x95   :  { %8079 = vst [vmem:[#allocation37_spill] sm:$0xff] %v6263_v7  ;;  %8080 = vst [vmem:[#allocation38_spill] sm:$0xff] %v6276_v56 }
  0x97   :  { %4836 = vmatpush3.xpose.msk.msra.mxu0 %vm146_vm0, %v6248_v0  ;;  %4870 = vmatpush3.xpose.msk.msra.mxu1 %vm146_vm0, %v6253_v57  ;;  %v6286_v57 = vld [vmem:[%s7967_s0 + $0x122] sm:$0xff]  ;;  %v6309_v0 = vld [vmem:[%s7967_s0 + $0x212] sm:$0xff] }
  0x98   :  { %4837 = vmatprep.subr.msk.mxu0 %vm146_vm0, %v6258_v59  ;;  %4871 = vmatprep.subr.msk.mxu1 %vm146_vm0, %v6263_v7  ;;  %8082 = vst [vmem:[#allocation40_spill] sm:$0xff] %v6286_v57  ;;  %v6291_v59 = vld [vmem:[%s7967_s0 + $0x2d2] sm:$0xff]  ;;  %v6304_v7 = vld [vmem:[%s7967_s0 + $0x62] sm:$0xff]  ;;  %8085 = vst [vmem:[#allocation43_spill] sm:$0xff] %v6309_v0 }
  0x99   :  { %8083 = vst [vmem:[#allocation41_spill] sm:$0xff] %v6291_v59  ;;  %8084 = vst [vmem:[#allocation42_spill] sm:$0xff] %v6304_v7 }
  0x9b   :  { %4838 = vmatpush3.xpose.msk.msra.mxu0 %vm146_vm0, %v6276_v56  ;;  %4872 = vmatpush3.xpose.msk.msra.mxu1 %vm146_vm0, %v6281_v55  ;;  %v6314_v55 = vld [vmem:[%s7967_s0 + $0x112] sm:$0xff]  ;;  %v6337_v56 = vld [vmem:[%s7967_s0 + $0x202] sm:$0xff] }
  0x9c   :  { %4839 = vmatprep.subr.msk.mxu0 %vm146_vm0, %v6286_v57  ;;  %4873 = vmatprep.subr.msk.mxu1 %vm146_vm0, %v6291_v59  ;;  %8086 = vst [vmem:[#allocation44_spill] sm:$0xff] %v6314_v55  ;;  %v6319_v57 = vld [vmem:[%s7967_s0 + $0x2c2] sm:$0xff]  ;;  %v6332_v59 = vld [vmem:[%s7967_s0 + $0x52] sm:$0xff]  ;;  %8089 = vst [vmem:[#allocation47_spill] sm:$0xff] %v6337_v56 }
  0x9d   :  { %8087 = vst [vmem:[#allocation45_spill] sm:$0xff] %v6319_v57  ;;  %8088 = vst [vmem:[#allocation46_spill] sm:$0xff] %v6332_v59 }
  0x9f   :  { %4840 = vmatpush3.xpose.msk.msra.mxu0 %vm146_vm0, %v6304_v7  ;;  %4874 = vmatpush3.xpose.msk.msra.mxu1 %vm146_vm0, %v6309_v0  ;;  %v6342_v0 = vld [vmem:[%s7967_s0 + $0x10a] sm:$0xff]  ;;  %v6365_v7 = vld [vmem:[%s7967_s0 + $0x1fa] sm:$0xff] }
  0xa0   :  { %4841 = vmatprep.subr.msk.mxu0 %vm146_vm0, %v6314_v55  ;;  %4875 = vmatprep.subr.msk.mxu1 %vm146_vm0, %v6319_v57  ;;  %8090 = vst [vmem:[#allocation48_spill] sm:$0xff] %v6342_v0  ;;  %v6347_v55 = vld [vmem:[%s7967_s0 + $0x2ba] sm:$0xff]  ;;  %v6360_v57 = vld [vmem:[%s7967_s0 + $0x4a] sm:$0xff]  ;;  %8093 = vst [vmem:[#allocation51_spill] sm:$0xff] %v6365_v7 }
  0xa1   :  { %8091 = vst [vmem:[#allocation49_spill] sm:$0xff] %v6347_v55  ;;  %8092 = vst [vmem:[#allocation50_spill] sm:$0xff] %v6360_v57 }
  0xa3   :  { %4842 = vmatpush3.xpose.msk.msra.mxu0 %vm146_vm0, %v6332_v59  ;;  %4876 = vmatpush3.xpose.msk.msra.mxu1 %vm146_vm0, %v6337_v56  ;;  %v6370_v56 = vld [vmem:[%s7967_s0 + $0xfa] sm:$0xff]  ;;  %v6393_v59 = vld [vmem:[%s7967_s0 + $0x1ea] sm:$0xff] }
  0xa4   :  { %4843 = vmatprep.subr.msk.mxu0 %vm146_vm0, %v6342_v0  ;;  %4877 = vmatprep.subr.msk.mxu1 %vm146_vm0, %v6347_v55  ;;  %8094 = vst [vmem:[#allocation52_spill] sm:$0xff] %v6370_v56  ;;  %v6375_v0 = vld [vmem:[%s7967_s0 + $0x2aa] sm:$0xff]  ;;  %v6388_v55 = vld [vmem:[%s7967_s0 + $0x3a] sm:$0xff]  ;;  %8097 = vst [vmem:[#allocation55_spill] sm:$0xff] %v6393_v59 }
  0xa5   :  { %8095 = vst [vmem:[#allocation53_spill] sm:$0xff] %v6375_v0  ;;  %8096 = vst [vmem:[#allocation54_spill] sm:$0xff] %v6388_v55 }
  0xa7   :  { %4844 = vmatpush3.xpose.msk.msra.mxu0 %vm146_vm0, %v6360_v57  ;;  %4878 = vmatpush3.xpose.msk.msra.mxu1 %vm146_vm0, %v6365_v7  ;;  %v6398_v7 = vld [vmem:[%s7967_s0 + $0xf2] sm:$0xff]  ;;  %v6421_v57 = vld [vmem:[%s7967_s0 + $0x1e2] sm:$0xff] }
  0xa8   :  { %4845 = vmatprep.subr.msk.mxu0 %vm146_vm0, %v6370_v56  ;;  %4879 = vmatprep.subr.msk.mxu1 %vm146_vm0, %v6375_v0  ;;  %8098 = vst [vmem:[#allocation56_spill] sm:$0xff] %v6398_v7  ;;  %v6403_v56 = vld [vmem:[%s7967_s0 + $0x2a2] sm:$0xff]  ;;  %v6416_v0 = vld [vmem:[%s7967_s0 + $0x32] sm:$0xff]  ;;  %8101 = vst [vmem:[#allocation59_spill] sm:$0xff] %v6421_v57 }
  0xa9   :  { %8099 = vst [vmem:[#allocation57_spill] sm:$0xff] %v6403_v56  ;;  %8100 = vst [vmem:[#allocation58_spill] sm:$0xff] %v6416_v0 }
  0xab   :  { %4846 = vmatpush3.xpose.msk.msra.mxu0 %vm146_vm0, %v6388_v55  ;;  %4880 = vmatpush3.xpose.msk.msra.mxu1 %vm146_vm0, %v6393_v59  ;;  %v6426_v59 = vld [vmem:[%s7967_s0 + $0xe2] sm:$0xff]  ;;  %v6449_v55 = vld [vmem:[%s7967_s0 + $0x1d2] sm:$0xff] }
  0xac   :  { %4847 = vmatprep.subr.msk.mxu0 %vm146_vm0, %v6398_v7  ;;  %4881 = vmatprep.subr.msk.mxu1 %vm146_vm0, %v6403_v56  ;;  %8102 = vst [vmem:[#allocation60_spill] sm:$0xff] %v6426_v59  ;;  %v6431_v7 = vld [vmem:[%s7967_s0 + $0x292] sm:$0xff]  ;;  %v6444_v56 = vld [vmem:[%s7967_s0 + $0x22] sm:$0xff]  ;;  %8105 = vst [vmem:[#allocation63_spill] sm:$0xff] %v6449_v55 }
  0xad   :  { %8103 = vst [vmem:[#allocation61_spill] sm:$0xff] %v6431_v7  ;;  %8104 = vst [vmem:[#allocation62_spill] sm:$0xff] %v6444_v56 }
  0xaf   :  { %4848 = vmatpush3.xpose.msk.msra.mxu0 %vm146_vm0, %v6416_v0  ;;  %4882 = vmatpush3.xpose.msk.msra.mxu1 %vm146_vm0, %v6421_v57  ;;  %v6454_v57 = vld [vmem:[%s7967_s0 + $0xda] sm:$0xff]  ;;  %v6477_v0 = vld [vmem:[%s7967_s0 + $0x1ca] sm:$0xff] }
  0xb0   :  { %4849 = vmatprep.subr.msk.mxu0 %vm146_vm0, %v6426_v59  ;;  %4883 = vmatprep.subr.msk.mxu1 %vm146_vm0, %v6431_v7  ;;  %8106 = vst [vmem:[#allocation64_spill] sm:$0xff] %v6454_v57  ;;  %v6459_v59 = vld [vmem:[%s7967_s0 + $0x28a] sm:$0xff]  ;;  %v6472_v7 = vld [vmem:[%s7967_s0 + $0x1a] sm:$0xff]  ;;  %8109 = vst [vmem:[#allocation67_spill] sm:$0xff] %v6477_v0 }
  0xb1   :  { %8107 = vst [vmem:[#allocation65_spill] sm:$0xff] %v6459_v59  ;;  %8108 = vst [vmem:[#allocation66_spill] sm:$0xff] %v6472_v7 }
  0xb3   :  { %4850 = vmatpush3.xpose.msk.msra.mxu0 %vm146_vm0, %v6444_v56  ;;  %4884 = vmatpush3.xpose.msk.msra.mxu1 %vm146_vm0, %v6449_v55  ;;  %v6482_v55 = vld [vmem:[%s7967_s0 + $0xca] sm:$0xff]  ;;  %v854_v56 = vld [vmem:[%s7967_s0 + $0x1ba] sm:$0xff] }
  0xb4   :  { %4851 = vmatprep.subr.msk.mxu0 %vm146_vm0, %v6454_v57  ;;  %4885 = vmatprep.subr.msk.mxu1 %vm146_vm0, %v6459_v59  ;;  %8110 = vst [vmem:[#allocation68_spill] sm:$0xff] %v6482_v55  ;;  %v6487_v57 = vld [vmem:[%s7967_s0 + $0x27a] sm:$0xff]  ;;  %v822_v59 = vld [vmem:[%s7967_s0 + $0xa] sm:$0xff] }
  0xb5   :  { %8111 = vst [vmem:[#allocation69_spill] sm:$0xff] %v6487_v57 }
  0xb7   :  { %4852 = vmatpush3.xpose.msk.msra.mxu0 %vm146_vm0, %v6472_v7  ;;  %4886 = vmatpush3.xpose.msk.msra.mxu1 %vm146_vm0, %v6477_v0  ;;  %v6506_v7 = vld [vmem:[%s7967_s0 + $0xc2] sm:$0xff]  ;;  %v6511_v0 = vld [vmem:[%s7967_s0 + $0x272] sm:$0xff] }
  0xb8   :  { %4853 = vmatprep.subr.msk.mxu0 %vm146_vm0, %v6482_v55  ;;  %4887 = vmatprep.subr.msk.mxu1 %vm146_vm0, %v6487_v57  ;;  %8112 = vst [vmem:[#allocation70_spill] sm:$0xff] %v6506_v7  ;;  %8113 = vst [vmem:[#allocation71_spill] sm:$0xff] %v6511_v0  ;;  %v821_v57 = vld [vmem:[%s7967_s0 + $0x2] sm:$0xff]  ;;  %v853_v55 = vld [vmem:[%s7967_s0 + $0x1b2] sm:$0xff] }
  0xbb   :  { %4854 = vmatpush3.xpose.msk.msra.mxu0 %vm146_vm0, %v822_v59  ;;  %4888 = vmatpush3.xpose.msk.msra.mxu1 %vm146_vm0, %v854_v56  ;;  %v6528_v59 = vld [vmem:[%s7967_s0 + $0x188] sm:$0xff]  ;;  %v6533_v56 = vld [vmem:[%s7967_s0 + $0x338] sm:$0xff] }
  0xbc   :  { %4855 = vmatprep.subr.msk.mxu0 %vm146_vm0, %v6506_v7  ;;  %4889 = vmatprep.subr.msk.mxu1 %vm146_vm0, %v6511_v0  ;;  %v6544_v0 = vld [vmem:[%s7967_s0 + $0x180] sm:$0xff]  ;;  %v6549_v7 = vld [vmem:[%s7967_s0 + $0x330] sm:$0xff] }
  0xbf   :  { %4856 = vmatpush3.xpose.msk.msra.mxu0 %vm146_vm0, %v821_v57  ;;  %4890 = vmatpush3.xpose.msk.msra.mxu1 %vm146_vm0, %v853_v55  ;;  %v6558_v55 = vld [vmem:[%s7968_s1 + $0x18] sm:$0xff] }
  0xc0   :  { %4893 = vmatprep.subr.msk.mxu0 %vm146_vm0, %v6528_v59  ;;  %4927 = vmatprep.subr.msk.mxu1 %vm146_vm0, %v6533_v56  ;;  %v7062_v57 = vld [vmem:[%s7967_s0 + $0x31] sm:$0xff] }
  0xc2   :  { %4858 = vmatmul.mubr.msk.f32.vlgmr.msra.gmra.mxu0 %vm146_vm0, %v6119_v62  ;;  %4892 = vmatmul.mubr.msk.f32.vlgmr.msra.gmra.mxu1 %vm146_vm0, %v6119_v62  ;;  %v7049_v62 = vld [vmem:[%s7967_s0 + $0x2a1] sm:$0xff] }
  0xc3   :  { %4894 = vmatpush3.xpose.msk.msra.mxu0 %vm146_vm0, %v6033_v60  ;;  %4928 = vmatpush3.xpose.msk.msra.mxu1 %vm146_vm0, %v6038_v63  ;;  %v7039_v60 = vld [vmem:[%s7967_s0 + $0x1e9] sm:$0xff]  ;;  %v7044_v63 = vld [vmem:[%s7967_s0 + $0xf1] sm:$0xff] }
  0xc4   :  { %4895 = vmatprep.subr.msk.mxu0 %vm146_vm0, %v6544_v0  ;;  %4929 = vmatprep.subr.msk.mxu1 %vm146_vm0, %v6549_v7 }
  0xc5   :  { %4925 = vmatprep.mubr.msk.f32.mxu0 %vm146_vm0, %v6558_v55  ;;  %4959 = vmatprep.mubr.msk.f32.mxu1 %vm146_vm0, %v6558_v55 }
  0xc7   :  { %4896 = vmatpush3.xpose.msk.msra.mxu0 %vm146_vm0, %v6057_v61  ;;  %4930 = vmatpush3.xpose.msk.msra.mxu1 %vm146_vm0, %v6062_v58  ;;  %v8114_v58 = vld [vmem:[#allocation9_spill] sm:$0xff]  ;;  %v6687_v61 = vld [vmem:[%s7967_s0 + $0x189] sm:$0xff] }
  0xc8   :  { %4897 = vmatprep.subr.msk.mxu0 %vm146_vm0, %v5630_v1  ;;  %4931 = vmatprep.subr.msk.mxu1 %vm146_vm0, %v5635_v2  ;;  %v6692_v1 = vld [vmem:[%s7967_s0 + $0x339] sm:$0xff]  ;;  %v8115_v2 = vld [vmem:[#allocation10_spill] sm:$0xff]  ;;  %8121 = vst [vmem:[#allocation9_spill] sm:$0xff] %v7039_v60 }
  0xc9   :  { %8122 = vst [vmem:[#allocation10_spill] sm:$0xff] %v7044_v63 }
  0xcb   :  { %4898 = vmatpush3.xpose.msk.msra.mxu0 %vm146_vm0, %v5646_v3  ;;  %4932 = vmatpush3.xpose.msk.msra.mxu1 %vm146_vm0, %v5651_v4  ;;  %v8116_v3 = vld [vmem:[#allocation11_spill] sm:$0xff]  ;;  %v6705_v4 = vld [vmem:[%s7967_s0 + $0x181] sm:$0xff] }
  0xcc   :  { %4899 = vmatprep.subr.msk.mxu0 %vm146_vm0, %v5656_v5  ;;  %4933 = vmatprep.subr.msk.mxu1 %vm146_vm0, %v5661_v6  ;;  %v6710_v5 = vld [vmem:[%s7967_s0 + $0x331] sm:$0xff]  ;;  %v6719_v6 = vld [vmem:[%s7968_s1 + $0x20] sm:$0xff]  ;;  %8123 = vst [vmem:[#allocation11_spill] sm:$0xff] %v7049_v62 }
  0xcf   :  { %4900 = vmatpush3.xpose.msk.msra.mxu0 %vm146_vm0, %v5683_v8  ;;  %4934 = vmatpush3.xpose.msk.msra.mxu1 %vm146_vm0, %v5688_v9  ;;  %v8117_v8 = vld [vmem:[#allocation5_spill] sm:$0xff]  ;;  %v8118_v9 = vld [vmem:[#allocation6_spill] sm:$0xff] }
  0xd0   :  { %4901 = vmatprep.subr.msk.mxu0 %vm146_vm0, %v5693_v10  ;;  %4935 = vmatprep.subr.msk.mxu1 %vm146_vm0, %v5698_v11  ;;  %v6732_v10 = vld [vmem:[%s7967_s0 + $0x171] sm:$0xff]  ;;  %v6737_v11 = vld [vmem:[%s7967_s0 + $0x321] sm:$0xff]  ;;  %8124 = vst [vmem:[#allocation5_spill] sm:$0xff] %v7062_v57 }
  0xd3   :  { %4902 = vmatpush3.xpose.msk.msra.mxu0 %vm146_vm0, %v5715_v12  ;;  %4936 = vmatpush3.xpose.msk.msra.mxu1 %vm146_vm0, %v5720_v13  ;;  %v8119_v12 = vld [vmem:[#allocation7_spill] sm:$0xff]  ;;  %v8120_v13 = vld [vmem:[#allocation8_spill] sm:$0xff] }
  0xd4   :  { %4903 = vmatprep.subr.msk.mxu0 %vm146_vm0, %v5725_v14  ;;  %4937 = vmatprep.subr.msk.mxu1 %vm146_vm0, %v5730_v15  ;;  %v6754_v14 = vld [vmem:[%s7967_s0 + $0xb1] sm:$0xff]  ;;  %v6759_v15 = vld [vmem:[%s7967_s0 + $0x261] sm:$0xff] }
  0xd7   :  { %4904 = vmatpush3.xpose.msk.msra.mxu0 %vm146_vm0, %v5743_v16  ;;  %4938 = vmatpush3.xpose.msk.msra.mxu1 %vm146_vm0, %v5748_v17  ;;  %v6764_v16 = vld [vmem:[%s7967_s0 + $0x169] sm:$0xff]  ;;  %v6769_v17 = vld [vmem:[%s7967_s0 + $0x319] sm:$0xff] }
  0xd8   :  { %4905 = vmatprep.subr.msk.mxu0 %vm146_vm0, %v5753_v18  ;;  %4939 = vmatprep.subr.msk.mxu1 %vm146_vm0, %v5758_v19  ;;  %v6782_v18 = vld [vmem:[%s7967_s0 + $0xa9] sm:$0xff]  ;;  %v6787_v19 = vld [vmem:[%s7967_s0 + $0x259] sm:$0xff] }
  0xdb   :  { %4906 = vmatpush3.xpose.msk.msra.mxu0 %vm146_vm0, %v5771_v20  ;;  %4940 = vmatpush3.xpose.msk.msra.mxu1 %vm146_vm0, %v5776_v21  ;;  %v6792_v20 = vld [vmem:[%s7967_s0 + $0x159] sm:$0xff]  ;;  %v6797_v21 = vld [vmem:[%s7967_s0 + $0x309] sm:$0xff] }
  0xdc   :  { %4907 = vmatprep.subr.msk.mxu0 %vm146_vm0, %v5781_v22  ;;  %4941 = vmatprep.subr.msk.mxu1 %vm146_vm0, %v5786_v23  ;;  %v6810_v22 = vld [vmem:[%s7967_s0 + $0x99] sm:$0xff]  ;;  %v6815_v23 = vld [vmem:[%s7967_s0 + $0x249] sm:$0xff] }
  0xdf   :  { %4908 = vmatpush3.xpose.msk.msra.mxu0 %vm146_vm0, %v5799_v24  ;;  %4942 = vmatpush3.xpose.msk.msra.mxu1 %vm146_vm0, %v5804_v25  ;;  %v6820_v24 = vld [vmem:[%s7967_s0 + $0x151] sm:$0xff]  ;;  %v6825_v25 = vld [vmem:[%s7967_s0 + $0x301] sm:$0xff] }
  0xe0   :  { %4909 = vmatprep.subr.msk.mxu0 %vm146_vm0, %v5809_v26  ;;  %4943 = vmatprep.subr.msk.mxu1 %vm146_vm0, %v5814_v27  ;;  %v6838_v26 = vld [vmem:[%s7967_s0 + $0x91] sm:$0xff]  ;;  %v6843_v27 = vld [vmem:[%s7967_s0 + $0x241] sm:$0xff] }
  0xe3   :  { %4910 = vmatpush3.xpose.msk.msra.mxu0 %vm146_vm0, %v5827_v28  ;;  %4944 = vmatpush3.xpose.msk.msra.mxu1 %vm146_vm0, %v5832_v29  ;;  %v6848_v28 = vld [vmem:[%s7967_s0 + $0x141] sm:$0xff]  ;;  %v6853_v29 = vld [vmem:[%s7967_s0 + $0x2f1] sm:$0xff] }
  0xe4   :  { %4911 = vmatprep.subr.msk.mxu0 %vm146_vm0, %v5837_v30  ;;  %4945 = vmatprep.subr.msk.mxu1 %vm146_vm0, %v5842_v31  ;;  %v6866_v30 = vld [vmem:[%s7967_s0 + $0x81] sm:$0xff]  ;;  %v6871_v31 = vld [vmem:[%s7967_s0 + $0x231] sm:$0xff] }
  0xe7   :  { %4912 = vmatpush3.xpose.msk.msra.mxu0 %vm146_vm0, %v5855_v32  ;;  %4946 = vmatpush3.xpose.msk.msra.mxu1 %vm146_vm0, %v5860_v33  ;;  %v6876_v32 = vld [vmem:[%s7967_s0 + $0x139] sm:$0xff]  ;;  %v6881_v33 = vld [vmem:[%s7967_s0 + $0x2e9] sm:$0xff] }
  0xe8   :  { %4913 = vmatprep.subr.msk.mxu0 %vm146_vm0, %v5865_v34  ;;  %4947 = vmatprep.subr.msk.mxu1 %vm146_vm0, %v5870_v35  ;;  %v6894_v34 = vld [vmem:[%s7967_s0 + $0x79] sm:$0xff]  ;;  %v6899_v35 = vld [vmem:[%s7967_s0 + $0x229] sm:$0xff] }
  0xeb   :  { %4914 = vmatpush3.xpose.msk.msra.mxu0 %vm146_vm0, %v5883_v36  ;;  %4948 = vmatpush3.xpose.msk.msra.mxu1 %vm146_vm0, %v5888_v37  ;;  %v6904_v36 = vld [vmem:[%s7967_s0 + $0x129] sm:$0xff]  ;;  %v6909_v37 = vld [vmem:[%s7967_s0 + $0x2d9] sm:$0xff] }
  0xec   :  { %4915 = vmatprep.subr.msk.mxu0 %vm146_vm0, %v5893_v38  ;;  %4949 = vmatprep.subr.msk.mxu1 %vm146_vm0, %v5898_v39  ;;  %v6922_v38 = vld [vmem:[%s7967_s0 + $0x69] sm:$0xff]  ;;  %v6927_v39 = vld [vmem:[%s7967_s0 + $0x219] sm:$0xff] }
  0xef   :  { %4916 = vmatpush3.xpose.msk.msra.mxu0 %vm146_vm0, %v5911_v40  ;;  %4950 = vmatpush3.xpose.msk.msra.mxu1 %vm146_vm0, %v5916_v41  ;;  %v6932_v40 = vld [vmem:[%s7967_s0 + $0x121] sm:$0xff]  ;;  %v6937_v41 = vld [vmem:[%s7967_s0 + $0x2d1] sm:$0xff] }
  0xf0   :  { %4917 = vmatprep.subr.msk.mxu0 %vm146_vm0, %v5921_v42  ;;  %4951 = vmatprep.subr.msk.mxu1 %vm146_vm0, %v5926_v43  ;;  %v6950_v42 = vld [vmem:[%s7967_s0 + $0x61] sm:$0xff]  ;;  %v6955_v43 = vld [vmem:[%s7967_s0 + $0x211] sm:$0xff] }
  0xf3   :  { %4918 = vmatpush3.xpose.msk.msra.mxu0 %vm146_vm0, %v5939_v44  ;;  %4952 = vmatpush3.xpose.msk.msra.mxu1 %vm146_vm0, %v5944_v45  ;;  %v6960_v44 = vld [vmem:[%s7967_s0 + $0x111] sm:$0xff]  ;;  %v6965_v45 = vld [vmem:[%s7967_s0 + $0x2c1] sm:$0xff] }
  0xf4   :  { %4919 = vmatprep.subr.msk.mxu0 %vm146_vm0, %v5949_v46  ;;  %4953 = vmatprep.subr.msk.mxu1 %vm146_vm0, %v5954_v47  ;;  %v6978_v46 = vld [vmem:[%s7967_s0 + $0x51] sm:$0xff]  ;;  %v6983_v47 = vld [vmem:[%s7967_s0 + $0x201] sm:$0xff] }
  0xf7   :  { %4920 = vmatpush3.xpose.msk.msra.mxu0 %vm146_vm0, %v5967_v48  ;;  %4954 = vmatpush3.xpose.msk.msra.mxu1 %vm146_vm0, %v5972_v49  ;;  %v6988_v48 = vld [vmem:[%s7967_s0 + $0x109] sm:$0xff]  ;;  %v6993_v49 = vld [vmem:[%s7967_s0 + $0x2b9] sm:$0xff] }
  0xf8   :  { %4921 = vmatprep.subr.msk.mxu0 %vm146_vm0, %v5977_v50  ;;  %4955 = vmatprep.subr.msk.mxu1 %vm146_vm0, %v5982_v51  ;;  %v7006_v50 = vld [vmem:[%s7967_s0 + $0x49] sm:$0xff]  ;;  %v7011_v51 = vld [vmem:[%s7967_s0 + $0x1f9] sm:$0xff] }
  0xfb   :  { %4922 = vmatpush3.xpose.msk.msra.mxu0 %vm146_vm0, %v5995_v52  ;;  %4956 = vmatpush3.xpose.msk.msra.mxu1 %vm146_vm0, %v6000_v53  ;;  %v7016_v52 = vld [vmem:[%s7967_s0 + $0xf9] sm:$0xff]  ;;  %v7021_v53 = vld [vmem:[%s7967_s0 + $0x2a9] sm:$0xff] }
  0xfc   :  { %4923 = vmatprep.subr.msk.mxu0 %vm146_vm0, %v6005_v54  ;;  %4957 = vmatprep.subr.msk.mxu1 %vm146_vm0, %v8114_v58  ;;  %v7034_v54 = vld [vmem:[%s7967_s0 + $0x39] sm:$0xff]  ;;  %v7072_v58 = vld [vmem:[%s7967_s0 + $0xe1] sm:$0xff] }
  0xff   :  { %4924 = vmatpush3.xpose.msk.msra.mxu0 %vm146_vm0, %v8115_v2  ;;  %4958 = vmatpush3.xpose.msk.msra.mxu1 %vm146_vm0, %v8116_v3  ;;  %v7077_v2 = vld [vmem:[%s7967_s0 + $0x291] sm:$0xff]  ;;  %v4035_v3 = vld [vmem:[%s7967_s0 + $0x21] sm:$0xff] }
 0x100   :  { %4961 = vmatprep.subr.msk.mxu0 %vm146_vm0, %v6687_v61  ;;  %4995 = vmatprep.subr.msk.mxu1 %vm146_vm0, %v6692_v1 }
 0x102   :  { %4926 = vmatmul.mubr.msk.f32.vlgmr.msra.gmra.mxu0 %vm146_vm0, %v6558_v55  ;;  %4960 = vmatmul.mubr.msk.f32.vlgmr.msra.gmra.mxu1 %vm146_vm0, %v6558_v55  ;;  %v7067_v55 = vld [vmem:[%s7967_s0 + $0x1e1] sm:$0xff] }
 0x103   :  { %4962 = vmatpush3.xpose.msk.msra.mxu0 %vm146_vm0, %v8117_v8  ;;  %4996 = vmatpush3.xpose.msk.msra.mxu1 %vm146_vm0, %v8118_v9  ;;  %8125 = vst [vmem:[#allocation6_spill] sm:$0xff] %v7067_v55  ;;  %v4067_v8 = vld [vmem:[%s7967_s0 + $0x1d1] sm:$0xff]  ;;  %v7096_v9 = vld [vmem:[%s7967_s0 + $0xd9] sm:$0xff] }
 0x104   :  { %4963 = vmatprep.subr.msk.mxu0 %vm146_vm0, %v6705_v4  ;;  %4997 = vmatprep.subr.msk.mxu1 %vm146_vm0, %v6710_v5 }
 0x105   :  { %4993 = vmatprep.mubr.msk.f32.mxu0 %vm146_vm0, %v6719_v6  ;;  %5027 = vmatprep.mubr.msk.f32.mxu1 %vm146_vm0, %v6719_v6 }
 0x107   :  { %4964 = vmatpush3.xpose.msk.msra.mxu0 %vm146_vm0, %v8119_v12  ;;  %4998 = vmatpush3.xpose.msk.msra.mxu1 %vm146_vm0, %v8120_v13  ;;  %v7101_v12 = vld [vmem:[%s7967_s0 + $0x289] sm:$0xff]  ;;  %v4034_v13 = vld [vmem:[%s7967_s0 + $0x19] sm:$0xff] }
 0x108   :  { %4965 = vmatprep.subr.msk.mxu0 %vm146_vm0, %v6732_v10  ;;  %4999 = vmatprep.subr.msk.mxu1 %vm146_vm0, %v6737_v11 }
 0x10b   :  { %4966 = vmatpush3.xpose.msk.msra.mxu0 %vm146_vm0, %v6754_v14  ;;  %5000 = vmatpush3.xpose.msk.msra.mxu1 %vm146_vm0, %v6759_v15 }
 0x10c   :  { %4967 = vmatprep.subr.msk.mxu0 %vm146_vm0, %v6764_v16  ;;  %5001 = vmatprep.subr.msk.mxu1 %vm146_vm0, %v6769_v17 }
 0x10f   :  { %4968 = vmatpush3.xpose.msk.msra.mxu0 %vm146_vm0, %v6782_v18  ;;  %5002 = vmatpush3.xpose.msk.msra.mxu1 %vm146_vm0, %v6787_v19 }
 0x110   :  { %4969 = vmatprep.subr.msk.mxu0 %vm146_vm0, %v6792_v20  ;;  %5003 = vmatprep.subr.msk.mxu1 %vm146_vm0, %v6797_v21 }
 0x113   :  { %4970 = vmatpush3.xpose.msk.msra.mxu0 %vm146_vm0, %v6810_v22  ;;  %5004 = vmatpush3.xpose.msk.msra.mxu1 %vm146_vm0, %v6815_v23 }
 0x114   :  { %4971 = vmatprep.subr.msk.mxu0 %vm146_vm0, %v6820_v24  ;;  %5005 = vmatprep.subr.msk.mxu1 %vm146_vm0, %v6825_v25 }
 0x117   :  { %4972 = vmatpush3.xpose.msk.msra.mxu0 %vm146_vm0, %v6838_v26  ;;  %5006 = vmatpush3.xpose.msk.msra.mxu1 %vm146_vm0, %v6843_v27 }
 0x118   :  { %4973 = vmatprep.subr.msk.mxu0 %vm146_vm0, %v6848_v28  ;;  %5007 = vmatprep.subr.msk.mxu1 %vm146_vm0, %v6853_v29 }
 0x11b   :  { %4974 = vmatpush3.xpose.msk.msra.mxu0 %vm146_vm0, %v6866_v30  ;;  %5008 = vmatpush3.xpose.msk.msra.mxu1 %vm146_vm0, %v6871_v31 }
 0x11c   :  { %4975 = vmatprep.subr.msk.mxu0 %vm146_vm0, %v6876_v32  ;;  %5009 = vmatprep.subr.msk.mxu1 %vm146_vm0, %v6881_v33 }
 0x11f   :  { %4976 = vmatpush3.xpose.msk.msra.mxu0 %vm146_vm0, %v6894_v34  ;;  %5010 = vmatpush3.xpose.msk.msra.mxu1 %vm146_vm0, %v6899_v35 }
 0x120   :  { %4977 = vmatprep.subr.msk.mxu0 %vm146_vm0, %v6904_v36  ;;  %5011 = vmatprep.subr.msk.mxu1 %vm146_vm0, %v6909_v37 }
 0x123   :  { %4978 = vmatpush3.xpose.msk.msra.mxu0 %vm146_vm0, %v6922_v38  ;;  %5012 = vmatpush3.xpose.msk.msra.mxu1 %vm146_vm0, %v6927_v39 }
 0x124   :  { %4979 = vmatprep.subr.msk.mxu0 %vm146_vm0, %v6932_v40  ;;  %5013 = vmatprep.subr.msk.mxu1 %vm146_vm0, %v6937_v41 }
 0x127   :  { %4980 = vmatpush3.xpose.msk.msra.mxu0 %vm146_vm0, %v6950_v42  ;;  %5014 = vmatpush3.xpose.msk.msra.mxu1 %vm146_vm0, %v6955_v43 }
 0x128   :  { %4981 = vmatprep.subr.msk.mxu0 %vm146_vm0, %v6960_v44  ;;  %5015 = vmatprep.subr.msk.mxu1 %vm146_vm0, %v6965_v45 }
 0x12b   :  { %4982 = vmatpush3.xpose.msk.msra.mxu0 %vm146_vm0, %v6978_v46  ;;  %5016 = vmatpush3.xpose.msk.msra.mxu1 %vm146_vm0, %v6983_v47 }
 0x12c   :  { %4983 = vmatprep.subr.msk.mxu0 %vm146_vm0, %v6988_v48  ;;  %5017 = vmatprep.subr.msk.mxu1 %vm146_vm0, %v6993_v49 }
 0x12f   :  { %4984 = vmatpush3.xpose.msk.msra.mxu0 %vm146_vm0, %v7006_v50  ;;  %5018 = vmatpush3.xpose.msk.msra.mxu1 %vm146_vm0, %v7011_v51 }
 0x130   :  { %4985 = vmatprep.subr.msk.mxu0 %vm146_vm0, %v7016_v52  ;;  %5019 = vmatprep.subr.msk.mxu1 %vm146_vm0, %v7021_v53 }
 0x133   :  { %4986 = vmatpush3.xpose.msk.msra.mxu0 %vm146_vm0, %v7034_v54  ;;  %5020 = vmatpush3.xpose.msk.msra.mxu1 %vm146_vm0, %v7039_v60  ;;  %v8139_v60 = vld [vmem:[#allocation17_spill] sm:$0xff] }
 0x134   :  { %4987 = vmatprep.subr.msk.mxu0 %vm146_vm0, %v7044_v63  ;;  %5021 = vmatprep.subr.msk.mxu1 %vm146_vm0, %v7049_v62  ;;  %v7139_v62 = vld [vmem:[%s7967_s0 + $0x332] sm:$0xff] }
 0x135   :  { %8129 = vst [vmem:[#allocation73_spill] sm:$0xff] %v7139_v62  ;;  %v8138_v63 = vld [vmem:[#allocation16_spill] sm:$0xff] }
 0x137   :  { %4988 = vmatpush3.xpose.msk.msra.mxu0 %vm146_vm0, %v7062_v57  ;;  %5022 = vmatpush3.xpose.msk.msra.mxu1 %vm146_vm0, %v7067_v55  ;;  %v4066_v55 = vld [vmem:[%s7967_s0 + $0x1c9] sm:$0xff] }
 0x138   :  { %4989 = vmatprep.subr.msk.mxu0 %vm146_vm0, %v7072_v58  ;;  %5023 = vmatprep.subr.msk.mxu1 %vm146_vm0, %v7077_v2  ;;  %v7134_v57 = vld [vmem:[%s7967_s0 + $0x182] sm:$0xff] }
 0x139   :  { %8128 = vst [vmem:[#allocation72_spill] sm:$0xff] %v7134_v57 }
 0x13b   :  { %4990 = vmatpush3.xpose.msk.msra.mxu0 %vm146_vm0, %v4035_v3  ;;  %5024 = vmatpush3.xpose.msk.msra.mxu1 %vm146_vm0, %v4067_v8  ;;  %v7118_v3 = vld [vmem:[%s7967_s0 + $0x18a] sm:$0xff]  ;;  %v7123_v8 = vld [vmem:[%s7967_s0 + $0x33a] sm:$0xff] }
 0x13c   :  { %4991 = vmatprep.subr.msk.mxu0 %vm146_vm0, %v7096_v9  ;;  %5025 = vmatprep.subr.msk.mxu1 %vm146_vm0, %v7101_v12  ;;  %8126 = vst [vmem:[#allocation7_spill] sm:$0xff] %v7118_v3  ;;  %8127 = vst [vmem:[#allocation8_spill] sm:$0xff] %v7123_v8 }
 0x13f   :  { %4992 = vmatpush3.xpose.msk.msra.mxu0 %vm146_vm0, %v4034_v13  ;;  %5026 = vmatpush3.xpose.msk.msra.mxu1 %vm146_vm0, %v4066_v55  ;;  %v7148_v55 = vld [vmem:[%s7968_s1 + $0x28] sm:$0xff]  ;;  %v8130_v13 = vld [vmem:[#allocation68_spill] sm:$0xff] }
 0x140   :  { %5029 = vmatprep.subr.msk.mxu0 %vm146_vm0, %v7118_v3  ;;  %5063 = vmatprep.subr.msk.mxu1 %vm146_vm0, %v7123_v8  ;;  %v8131_v8 = vld [vmem:[#allocation69_spill] sm:$0xff]  ;;  %v8133_v3 = vld [vmem:[#allocation71_spill] sm:$0xff] }
 0x142   :  { %4994 = vmatmul.mubr.msk.f32.vlgmr.msra.gmra.mxu0 %vm146_vm0, %v6719_v6  ;;  %5028 = vmatmul.mubr.msk.f32.vlgmr.msra.gmra.mxu1 %vm146_vm0, %v6719_v6  ;;  %v8132_v6 = vld [vmem:[#allocation70_spill] sm:$0xff] }
 0x143   :  { %5030 = vmatpush3.xpose.msk.msra.mxu0 %vm146_vm0, %v8130_v13  ;;  %5064 = vmatpush3.xpose.msk.msra.mxu1 %vm146_vm0, %v8131_v8  ;;  %v8134_v13 = vld [vmem:[#allocation12_spill] sm:$0xff]  ;;  %v8135_v8 = vld [vmem:[#allocation13_spill] sm:$0xff] }
 0x144   :  { %5031 = vmatprep.subr.msk.mxu0 %vm146_vm0, %v7134_v57  ;;  %5065 = vmatprep.subr.msk.mxu1 %vm146_vm0, %v7139_v62  ;;  %v8136_v57 = vld [vmem:[#allocation14_spill] sm:$0xff]  ;;  %v8137_v62 = vld [vmem:[#allocation15_spill] sm:$0xff] }
 0x145   :  { %5061 = vmatprep.mubr.msk.f32.mxu0 %vm146_vm0, %v7148_v55  ;;  %5095 = vmatprep.mubr.msk.f32.mxu1 %vm146_vm0, %v7148_v55 }
 0x147   :  { %5032 = vmatpush3.xpose.msk.msra.mxu0 %vm146_vm0, %v8132_v6  ;;  %5066 = vmatpush3.xpose.msk.msra.mxu1 %vm146_vm0, %v8133_v3  ;;  %v8140_v6 = vld [vmem:[#allocation18_spill] sm:$0xff]  ;;  %v8141_v3 = vld [vmem:[#allocation19_spill] sm:$0xff] }
 0x148   :  { %5033 = vmatprep.subr.msk.mxu0 %vm146_vm0, %v8134_v13  ;;  %5067 = vmatprep.subr.msk.mxu1 %vm146_vm0, %v8135_v8  ;;  %v8142_v13 = vld [vmem:[#allocation20_spill] sm:$0xff]  ;;  %v8143_v8 = vld [vmem:[#allocation21_spill] sm:$0xff] }
 0x14b   :  { %5034 = vmatpush3.xpose.msk.msra.mxu0 %vm146_vm0, %v8136_v57  ;;  %5068 = vmatpush3.xpose.msk.msra.mxu1 %vm146_vm0, %v8137_v62  ;;  %v8144_v57 = vld [vmem:[#allocation22_spill] sm:$0xff]  ;;  %v8145_v62 = vld [vmem:[#allocation23_spill] sm:$0xff] }
 0x14c   :  { %5035 = vmatprep.subr.msk.mxu0 %vm146_vm0, %v8138_v63  ;;  %5069 = vmatprep.subr.msk.mxu1 %vm146_vm0, %v8139_v60  ;;  %v8146_v63 = vld [vmem:[#allocation24_spill] sm:$0xff]  ;;  %v8147_v60 = vld [vmem:[#allocation25_spill] sm:$0xff] }
 0x14f   :  { %5036 = vmatpush3.xpose.msk.msra.mxu0 %vm146_vm0, %v8140_v6  ;;  %5070 = vmatpush3.xpose.msk.msra.mxu1 %vm146_vm0, %v8141_v3  ;;  %v8148_v6 = vld [vmem:[#allocation26_spill] sm:$0xff]  ;;  %v8149_v3 = vld [vmem:[#allocation27_spill] sm:$0xff] }
 0x150   :  { %5037 = vmatprep.subr.msk.mxu0 %vm146_vm0, %v8142_v13  ;;  %5071 = vmatprep.subr.msk.mxu1 %vm146_vm0, %v8143_v8  ;;  %v8150_v13 = vld [vmem:[#allocation28_spill] sm:$0xff]  ;;  %v8151_v8 = vld [vmem:[#allocation29_spill] sm:$0xff] }
 0x153   :  { %5038 = vmatpush3.xpose.msk.msra.mxu0 %vm146_vm0, %v8144_v57  ;;  %5072 = vmatpush3.xpose.msk.msra.mxu1 %vm146_vm0, %v8145_v62  ;;  %v8152_v57 = vld [vmem:[#allocation30_spill] sm:$0xff]  ;;  %v8153_v62 = vld [vmem:[#allocation31_spill] sm:$0xff] }
 0x154   :  { %5039 = vmatprep.subr.msk.mxu0 %vm146_vm0, %v8146_v63  ;;  %5073 = vmatprep.subr.msk.mxu1 %vm146_vm0, %v8147_v60  ;;  %v8154_v63 = vld [vmem:[#allocation32_spill] sm:$0xff]  ;;  %v8155_v60 = vld [vmem:[#allocation33_spill] sm:$0xff] }
 0x157   :  { %5040 = vmatpush3.xpose.msk.msra.mxu0 %vm146_vm0, %v8148_v6  ;;  %5074 = vmatpush3.xpose.msk.msra.mxu1 %vm146_vm0, %v8149_v3  ;;  %v8156_v6 = vld [vmem:[#allocation34_spill] sm:$0xff]  ;;  %v8157_v3 = vld [vmem:[#allocation35_spill] sm:$0xff] }
 0x158   :  { %5041 = vmatprep.subr.msk.mxu0 %vm146_vm0, %v8150_v13  ;;  %5075 = vmatprep.subr.msk.mxu1 %vm146_vm0, %v8151_v8  ;;  %v8158_v13 = vld [vmem:[#allocation36_spill] sm:$0xff]  ;;  %v8159_v8 = vld [vmem:[#allocation37_spill] sm:$0xff] }
 0x15b   :  { %5042 = vmatpush3.xpose.msk.msra.mxu0 %vm146_vm0, %v8152_v57  ;;  %5076 = vmatpush3.xpose.msk.msra.mxu1 %vm146_vm0, %v8153_v62  ;;  %v8160_v57 = vld [vmem:[#allocation38_spill] sm:$0xff]  ;;  %v8161_v62 = vld [vmem:[#allocation39_spill] sm:$0xff] }
 0x15c   :  { %5043 = vmatprep.subr.msk.mxu0 %vm146_vm0, %v8154_v63  ;;  %5077 = vmatprep.subr.msk.mxu1 %vm146_vm0, %v8155_v60  ;;  %v8162_v63 = vld [vmem:[#allocation40_spill] sm:$0xff]  ;;  %v8163_v60 = vld [vmem:[#allocation41_spill] sm:$0xff] }
 0x15f   :  { %5044 = vmatpush3.xpose.msk.msra.mxu0 %vm146_vm0, %v8156_v6  ;;  %5078 = vmatpush3.xpose.msk.msra.mxu1 %vm146_vm0, %v8157_v3  ;;  %v8164_v6 = vld [vmem:[#allocation42_spill] sm:$0xff]  ;;  %v8165_v3 = vld [vmem:[#allocation43_spill] sm:$0xff] }
 0x160   :  { %5045 = vmatprep.subr.msk.mxu0 %vm146_vm0, %v8158_v13  ;;  %5079 = vmatprep.subr.msk.mxu1 %vm146_vm0, %v8159_v8  ;;  %v8166_v13 = vld [vmem:[#allocation44_spill] sm:$0xff]  ;;  %v8167_v8 = vld [vmem:[#allocation45_spill] sm:$0xff] }
 0x163   :  { %5046 = vmatpush3.xpose.msk.msra.mxu0 %vm146_vm0, %v8160_v57  ;;  %5080 = vmatpush3.xpose.msk.msra.mxu1 %vm146_vm0, %v8161_v62  ;;  %v8168_v57 = vld [vmem:[#allocation46_spill] sm:$0xff]  ;;  %v8169_v62 = vld [vmem:[#allocation47_spill] sm:$0xff] }
 0x164   :  { %5047 = vmatprep.subr.msk.mxu0 %vm146_vm0, %v8162_v63  ;;  %5081 = vmatprep.subr.msk.mxu1 %vm146_vm0, %v8163_v60  ;;  %v8170_v63 = vld [vmem:[#allocation48_spill] sm:$0xff]  ;;  %v8171_v60 = vld [vmem:[#allocation49_spill] sm:$0xff] }
 0x167   :  { %5048 = vmatpush3.xpose.msk.msra.mxu0 %vm146_vm0, %v8164_v6  ;;  %5082 = vmatpush3.xpose.msk.msra.mxu1 %vm146_vm0, %v8165_v3  ;;  %v8172_v6 = vld [vmem:[#allocation50_spill] sm:$0xff]  ;;  %v8173_v3 = vld [vmem:[#allocation51_spill] sm:$0xff] }
 0x168   :  { %5049 = vmatprep.subr.msk.mxu0 %vm146_vm0, %v8166_v13  ;;  %5083 = vmatprep.subr.msk.mxu1 %vm146_vm0, %v8167_v8  ;;  %v8174_v13 = vld [vmem:[#allocation52_spill] sm:$0xff]  ;;  %v8175_v8 = vld [vmem:[#allocation53_spill] sm:$0xff] }
 0x16b   :  { %5050 = vmatpush3.xpose.msk.msra.mxu0 %vm146_vm0, %v8168_v57  ;;  %5084 = vmatpush3.xpose.msk.msra.mxu1 %vm146_vm0, %v8169_v62  ;;  %v8176_v57 = vld [vmem:[#allocation54_spill] sm:$0xff]  ;;  %v8177_v62 = vld [vmem:[#allocation55_spill] sm:$0xff] }
 0x16c   :  { %5051 = vmatprep.subr.msk.mxu0 %vm146_vm0, %v8170_v63  ;;  %5085 = vmatprep.subr.msk.mxu1 %vm146_vm0, %v8171_v60  ;;  %v8178_v63 = vld [vmem:[#allocation56_spill] sm:$0xff]  ;;  %v8179_v60 = vld [vmem:[#allocation57_spill] sm:$0xff] }
 0x16f   :  { %5052 = vmatpush3.xpose.msk.msra.mxu0 %vm146_vm0, %v8172_v6  ;;  %5086 = vmatpush3.xpose.msk.msra.mxu1 %vm146_vm0, %v8173_v3  ;;  %v8180_v6 = vld [vmem:[#allocation58_spill] sm:$0xff]  ;;  %v8181_v3 = vld [vmem:[#allocation59_spill] sm:$0xff] }
 0x170   :  { %5053 = vmatprep.subr.msk.mxu0 %vm146_vm0, %v8174_v13  ;;  %5087 = vmatprep.subr.msk.mxu1 %vm146_vm0, %v8175_v8  ;;  %v8182_v13 = vld [vmem:[#allocation60_spill] sm:$0xff]  ;;  %v8183_v8 = vld [vmem:[#allocation61_spill] sm:$0xff] }
 0x173   :  { %5054 = vmatpush3.xpose.msk.msra.mxu0 %vm146_vm0, %v8176_v57  ;;  %5088 = vmatpush3.xpose.msk.msra.mxu1 %vm146_vm0, %v8177_v62  ;;  %v8184_v57 = vld [vmem:[#allocation62_spill] sm:$0xff]  ;;  %v8185_v62 = vld [vmem:[#allocation63_spill] sm:$0xff] }
 0x174   :  { %5055 = vmatprep.subr.msk.mxu0 %vm146_vm0, %v8178_v63  ;;  %5089 = vmatprep.subr.msk.mxu1 %vm146_vm0, %v8179_v60  ;;  %v8186_v63 = vld [vmem:[#allocation64_spill] sm:$0xff]  ;;  %v8187_v60 = vld [vmem:[#allocation65_spill] sm:$0xff] }
 0x177   :  { %5056 = vmatpush3.xpose.msk.msra.mxu0 %vm146_vm0, %v8180_v6  ;;  %5090 = vmatpush3.xpose.msk.msra.mxu1 %vm146_vm0, %v8181_v3  ;;  %v4327_v6 = vld [vmem:[%s7967_s0 + $0x1a0] sm:$0xff]  ;;  %v4359_v3 = vld [vmem:[%s7967_s0 + $0x350] sm:$0xff] }
 0x178   :  { %5057 = vmatprep.subr.msk.mxu0 %vm146_vm0, %v8182_v13  ;;  %5091 = vmatprep.subr.msk.mxu1 %vm146_vm0, %v8183_v8  ;;  %v8188_v13 = vld [vmem:[#allocation66_spill] sm:$0xff]  ;;  %v8189_v8 = vld [vmem:[#allocation67_spill] sm:$0xff] }
 0x17b   :  { %5058 = vmatpush3.xpose.msk.msra.mxu0 %vm146_vm0, %v8184_v57  ;;  %5092 = vmatpush3.xpose.msk.msra.mxu1 %vm146_vm0, %v8185_v62  ;;  %v4311_v57 = vld [vmem:[%s7967_s0 + $0xe0] sm:$0xff]  ;;  %v4343_v62 = vld [vmem:[%s7967_s0 + $0x290] sm:$0xff] }
 0x17c   :  { %5059 = vmatprep.subr.msk.mxu0 %vm146_vm0, %v8186_v63  ;;  %5093 = vmatprep.subr.msk.mxu1 %vm146_vm0, %v8187_v60  ;;  %v4326_v63 = vld [vmem:[%s7967_s0 + $0x198] sm:$0xff]  ;;  %v4358_v60 = vld [vmem:[%s7967_s0 + $0x348] sm:$0xff] }
 0x17f   :  { %5060 = vmatpush3.xpose.msk.msra.mxu0 %vm146_vm0, %v8188_v13  ;;  %5094 = vmatpush3.xpose.msk.msra.mxu1 %vm146_vm0, %v8189_v8  ;;  %v4309_v13 = vld [vmem:[%s7967_s0 + $0xc8] sm:$0xff]  ;;  %v4341_v8 = vld [vmem:[%s7967_s0 + $0x278] sm:$0xff] }
 0x180   :  { %5097 = vmatprep.subr.msk.mxu0 %vm146_vm0, %v4327_v6  ;;  %5131 = vmatprep.subr.msk.mxu1 %vm146_vm0, %v4359_v3  ;;  %v7305_v6 = vld [vmem:[%s7968_s1 + $0x30] sm:$0xff]  ;;  %v4310_v3 = vld [vmem:[%s7967_s0 + $0xd8] sm:$0xff] }
 0x182   :  { %5062 = vmatmul.mubr.msk.f32.vlgmr.msra.gmra.mxu0 %vm146_vm0, %v7148_v55  ;;  %5096 = vmatmul.mubr.msk.f32.vlgmr.msra.gmra.mxu1 %vm146_vm0, %v7148_v55  ;;  %v4342_v55 = vld [vmem:[%s7967_s0 + $0x288] sm:$0xff] }
 0x183   :  { %5098 = vmatpush3.xpose.msk.msra.mxu0 %vm146_vm0, %v4311_v57  ;;  %5132 = vmatpush3.xpose.msk.msra.mxu1 %vm146_vm0, %v4343_v62  ;;  %v4323_v57 = vld [vmem:[%s7967_s0 + $0x170] sm:$0xff]  ;;  %v4355_v62 = vld [vmem:[%s7967_s0 + $0x320] sm:$0xff] }
 0x184   :  { %5099 = vmatprep.subr.msk.mxu0 %vm146_vm0, %v4326_v63  ;;  %5133 = vmatprep.subr.msk.mxu1 %vm146_vm0, %v4358_v60  ;;  %v4322_v63 = vld [vmem:[%s7967_s0 + $0x168] sm:$0xff]  ;;  %v4354_v60 = vld [vmem:[%s7967_s0 + $0x318] sm:$0xff] }
 0x185   :  { %5129 = vmatprep.mubr.msk.f32.mxu0 %vm146_vm0, %v7305_v6  ;;  %5163 = vmatprep.mubr.msk.f32.mxu1 %vm146_vm0, %v7305_v6 }
 0x187   :  { %5100 = vmatpush3.xpose.msk.msra.mxu0 %vm146_vm0, %v4310_v3  ;;  %5134 = vmatpush3.xpose.msk.msra.mxu1 %vm146_vm0, %v4342_v55  ;;  %v4306_v3 = vld [vmem:[%s7967_s0 + $0xa8] sm:$0xff]  ;;  %v4338_v55 = vld [vmem:[%s7967_s0 + $0x258] sm:$0xff] }
 0x188   :  { %5101 = vmatprep.subr.msk.mxu0 %vm146_vm0, %v6528_v59  ;;  %5135 = vmatprep.subr.msk.mxu1 %vm146_vm0, %v6533_v56  ;;  %v4308_v59 = vld [vmem:[%s7967_s0 + $0xc0] sm:$0xff]  ;;  %v4340_v56 = vld [vmem:[%s7967_s0 + $0x270] sm:$0xff] }
 0x18b   :  { %5102 = vmatpush3.xpose.msk.msra.mxu0 %vm146_vm0, %v4309_v13  ;;  %5136 = vmatpush3.xpose.msk.msra.mxu1 %vm146_vm0, %v4341_v8  ;;  %v4321_v13 = vld [vmem:[%s7967_s0 + $0x158] sm:$0xff]  ;;  %v4353_v8 = vld [vmem:[%s7967_s0 + $0x308] sm:$0xff] }
 0x18c   :  { %5103 = vmatprep.subr.msk.mxu0 %vm146_vm0, %v6544_v0  ;;  %5137 = vmatprep.subr.msk.mxu1 %vm146_vm0, %v6549_v7  ;;  %v4307_v0 = vld [vmem:[%s7967_s0 + $0xb0] sm:$0xff]  ;;  %v4339_v7 = vld [vmem:[%s7967_s0 + $0x260] sm:$0xff] }
 0x18f   :  { %5104 = vmatpush3.xpose.msk.msra.mxu0 %vm146_vm0, %v4308_v59  ;;  %5138 = vmatpush3.xpose.msk.msra.mxu1 %vm146_vm0, %v4340_v56  ;;  %v4305_v59 = vld [vmem:[%s7967_s0 + $0x98] sm:$0xff]  ;;  %v4337_v56 = vld [vmem:[%s7967_s0 + $0x248] sm:$0xff] }
 0x190   :  { %5105 = vmatprep.subr.msk.mxu0 %vm146_vm0, %v4323_v57  ;;  %5139 = vmatprep.subr.msk.mxu1 %vm146_vm0, %v4355_v62  ;;  %v4320_v57 = vld [vmem:[%s7967_s0 + $0x150] sm:$0xff]  ;;  %v4352_v62 = vld [vmem:[%s7967_s0 + $0x300] sm:$0xff] }
 0x193   :  { %5106 = vmatpush3.xpose.msk.msra.mxu0 %vm146_vm0, %v4307_v0  ;;  %5140 = vmatpush3.xpose.msk.msra.mxu1 %vm146_vm0, %v4339_v7  ;;  %v4304_v0 = vld [vmem:[%s7967_s0 + $0x90] sm:$0xff]  ;;  %v4336_v7 = vld [vmem:[%s7967_s0 + $0x240] sm:$0xff] }
 0x194   :  { %5107 = vmatprep.subr.msk.mxu0 %vm146_vm0, %v4322_v63  ;;  %5141 = vmatprep.subr.msk.mxu1 %vm146_vm0, %v4354_v60  ;;  %v4319_v63 = vld [vmem:[%s7967_s0 + $0x140] sm:$0xff]  ;;  %v4351_v60 = vld [vmem:[%s7967_s0 + $0x2f0] sm:$0xff] }
 0x197   :  { %5108 = vmatpush3.xpose.msk.msra.mxu0 %vm146_vm0, %v4306_v3  ;;  %5142 = vmatpush3.xpose.msk.msra.mxu1 %vm146_vm0, %v4338_v55  ;;  %v4303_v3 = vld [vmem:[%s7967_s0 + $0x80] sm:$0xff]  ;;  %v4335_v55 = vld [vmem:[%s7967_s0 + $0x230] sm:$0xff] }
 0x198   :  { %5109 = vmatprep.subr.msk.mxu0 %vm146_vm0, %v4321_v13  ;;  %5143 = vmatprep.subr.msk.mxu1 %vm146_vm0, %v4353_v8  ;;  %v4318_v13 = vld [vmem:[%s7967_s0 + $0x138] sm:$0xff]  ;;  %v4350_v8 = vld [vmem:[%s7967_s0 + $0x2e8] sm:$0xff] }
 0x19b   :  { %5110 = vmatpush3.xpose.msk.msra.mxu0 %vm146_vm0, %v4305_v59  ;;  %5144 = vmatpush3.xpose.msk.msra.mxu1 %vm146_vm0, %v4337_v56  ;;  %v4302_v59 = vld [vmem:[%s7967_s0 + $0x78] sm:$0xff]  ;;  %v4334_v56 = vld [vmem:[%s7967_s0 + $0x228] sm:$0xff] }
 0x19c   :  { %5111 = vmatprep.subr.msk.mxu0 %vm146_vm0, %v4320_v57  ;;  %5145 = vmatprep.subr.msk.mxu1 %vm146_vm0, %v4352_v62  ;;  %v4317_v57 = vld [vmem:[%s7967_s0 + $0x128] sm:$0xff]  ;;  %v4349_v62 = vld [vmem:[%s7967_s0 + $0x2d8] sm:$0xff] }
 0x19f   :  { %5112 = vmatpush3.xpose.msk.msra.mxu0 %vm146_vm0, %v4304_v0  ;;  %5146 = vmatpush3.xpose.msk.msra.mxu1 %vm146_vm0, %v4336_v7  ;;  %v4301_v0 = vld [vmem:[%s7967_s0 + $0x68] sm:$0xff]  ;;  %v4333_v7 = vld [vmem:[%s7967_s0 + $0x218] sm:$0xff] }
 0x1a0   :  { %5113 = vmatprep.subr.msk.mxu0 %vm146_vm0, %v4319_v63  ;;  %5147 = vmatprep.subr.msk.mxu1 %vm146_vm0, %v4351_v60  ;;  %v4316_v63 = vld [vmem:[%s7967_s0 + $0x120] sm:$0xff]  ;;  %v4348_v60 = vld [vmem:[%s7967_s0 + $0x2d0] sm:$0xff] }
 0x1a3   :  { %5114 = vmatpush3.xpose.msk.msra.mxu0 %vm146_vm0, %v4303_v3  ;;  %5148 = vmatpush3.xpose.msk.msra.mxu1 %vm146_vm0, %v4335_v55  ;;  %v4300_v3 = vld [vmem:[%s7967_s0 + $0x60] sm:$0xff]  ;;  %v4332_v55 = vld [vmem:[%s7967_s0 + $0x210] sm:$0xff] }
 0x1a4   :  { %5115 = vmatprep.subr.msk.mxu0 %vm146_vm0, %v4318_v13  ;;  %5149 = vmatprep.subr.msk.mxu1 %vm146_vm0, %v4350_v8  ;;  %v4315_v13 = vld [vmem:[%s7967_s0 + $0x110] sm:$0xff]  ;;  %v4347_v8 = vld [vmem:[%s7967_s0 + $0x2c0] sm:$0xff] }
 0x1a7   :  { %5116 = vmatpush3.xpose.msk.msra.mxu0 %vm146_vm0, %v4302_v59  ;;  %5150 = vmatpush3.xpose.msk.msra.mxu1 %vm146_vm0, %v4334_v56  ;;  %v4299_v59 = vld [vmem:[%s7967_s0 + $0x50] sm:$0xff]  ;;  %v4331_v56 = vld [vmem:[%s7967_s0 + $0x200] sm:$0xff] }
 0x1a8   :  { %5117 = vmatprep.subr.msk.mxu0 %vm146_vm0, %v4317_v57  ;;  %5151 = vmatprep.subr.msk.mxu1 %vm146_vm0, %v4349_v62  ;;  %v4314_v57 = vld [vmem:[%s7967_s0 + $0x108] sm:$0xff]  ;;  %v4346_v62 = vld [vmem:[%s7967_s0 + $0x2b8] sm:$0xff] }
 0x1ab   :  { %5118 = vmatpush3.xpose.msk.msra.mxu0 %vm146_vm0, %v4301_v0  ;;  %5152 = vmatpush3.xpose.msk.msra.mxu1 %vm146_vm0, %v4333_v7  ;;  %v4298_v0 = vld [vmem:[%s7967_s0 + $0x48] sm:$0xff]  ;;  %v4330_v7 = vld [vmem:[%s7967_s0 + $0x1f8] sm:$0xff] }
 0x1ac   :  { %5119 = vmatprep.subr.msk.mxu0 %vm146_vm0, %v4316_v63  ;;  %5153 = vmatprep.subr.msk.mxu1 %vm146_vm0, %v4348_v60  ;;  %v4313_v63 = vld [vmem:[%s7967_s0 + $0xf8] sm:$0xff]  ;;  %v4345_v60 = vld [vmem:[%s7967_s0 + $0x2a8] sm:$0xff] }
 0x1af   :  { %5120 = vmatpush3.xpose.msk.msra.mxu0 %vm146_vm0, %v4300_v3  ;;  %5154 = vmatpush3.xpose.msk.msra.mxu1 %vm146_vm0, %v4332_v55  ;;  %v4297_v3 = vld [vmem:[%s7967_s0 + $0x38] sm:$0xff]  ;;  %v4329_v55 = vld [vmem:[%s7967_s0 + $0x1e8] sm:$0xff] }
 0x1b0   :  { %5121 = vmatprep.subr.msk.mxu0 %vm146_vm0, %v4315_v13  ;;  %5155 = vmatprep.subr.msk.mxu1 %vm146_vm0, %v4347_v8  ;;  %v4312_v13 = vld [vmem:[%s7967_s0 + $0xf0] sm:$0xff]  ;;  %v4344_v8 = vld [vmem:[%s7967_s0 + $0x2a0] sm:$0xff] }
 0x1b3   :  { %5122 = vmatpush3.xpose.msk.msra.mxu0 %vm146_vm0, %v4299_v59  ;;  %5156 = vmatpush3.xpose.msk.msra.mxu1 %vm146_vm0, %v4331_v56  ;;  %v4296_v59 = vld [vmem:[%s7967_s0 + $0x30] sm:$0xff]  ;;  %v4328_v56 = vld [vmem:[%s7967_s0 + $0x1e0] sm:$0xff] }
 0x1b4   :  { %5123 = vmatprep.subr.msk.mxu0 %vm146_vm0, %v4314_v57  ;;  %5157 = vmatprep.subr.msk.mxu1 %vm146_vm0, %v4346_v62  ;;  %v4458_v57 = vld [vmem:[%s7967_s0 + $0x1a1] sm:$0xff]  ;;  %v4490_v62 = vld [vmem:[%s7967_s0 + $0x351] sm:$0xff] }
 0x1b7   :  { %5124 = vmatpush3.xpose.msk.msra.mxu0 %vm146_vm0, %v4298_v0  ;;  %5158 = vmatpush3.xpose.msk.msra.mxu1 %vm146_vm0, %v4330_v7  ;;  %v4457_v0 = vld [vmem:[%s7967_s0 + $0x199] sm:$0xff]  ;;  %v4489_v7 = vld [vmem:[%s7967_s0 + $0x349] sm:$0xff] }
 0x1b8   :  { %5125 = vmatprep.subr.msk.mxu0 %vm146_vm0, %v4313_v63  ;;  %5159 = vmatprep.subr.msk.mxu1 %vm146_vm0, %v4345_v60  ;;  %v7560_v63 = vld [vmem:[%s7968_s1 + $0x38] sm:$0xff]  ;;  %v4579_v60 = vld [vmem:[%s7967_s0 + $0x12a] sm:$0xff] }
 0x1bb   :  { %5126 = vmatpush3.xpose.msk.msra.mxu0 %vm146_vm0, %v4297_v3  ;;  %5160 = vmatpush3.xpose.msk.msra.mxu1 %vm146_vm0, %v4329_v55  ;;  %v4611_v3 = vld [vmem:[%s7967_s0 + $0x2da] sm:$0xff]  ;;  %v4563_v55 = vld [vmem:[%s7967_s0 + $0x6a] sm:$0xff] }
 0x1bc   :  { %5127 = vmatprep.subr.msk.mxu0 %vm146_vm0, %v4312_v13  ;;  %5161 = vmatprep.subr.msk.mxu1 %vm146_vm0, %v4344_v8  ;;  %v4595_v13 = vld [vmem:[%s7967_s0 + $0x21a] sm:$0xff]  ;;  %v4578_v8 = vld [vmem:[%s7967_s0 + $0x122] sm:$0xff] }
 0x1bf   :  { %5128 = vmatpush3.xpose.msk.msra.mxu0 %vm146_vm0, %v4296_v59  ;;  %5162 = vmatpush3.xpose.msk.msra.mxu1 %vm146_vm0, %v4328_v56  ;;  %v4610_v59 = vld [vmem:[%s7967_s0 + $0x2d2] sm:$0xff]  ;;  %v4562_v56 = vld [vmem:[%s7967_s0 + $0x62] sm:$0xff] }
 0x1c0   :  { %5165 = vmatprep.subr.msk.mxu0 %vm146_vm0, %v4458_v57  ;;  %5199 = vmatprep.subr.msk.mxu1 %vm146_vm0, %v4490_v62  ;;  %v4594_v57 = vld [vmem:[%s7967_s0 + $0x212] sm:$0xff] }
 0x1c1   :  { %v4577_v62 = vld [vmem:[%s7967_s0 + $0x112] sm:$0xff] }
 0x1c2   :  { %5130 = vmatmul.mubr.msk.f32.vlgmr.msra.gmra.mxu0 %vm146_vm0, %v7305_v6  ;;  %5164 = vmatmul.mubr.msk.f32.vlgmr.msra.gmra.mxu1 %vm146_vm0, %v7305_v6  ;;  %v4596_v6 = vld [vmem:[%s7967_s0 + $0x22a] sm:$0xff] }
 0x1c3   :  { %5166 = vmatpush3.xpose.msk.msra.mxu0 %vm146_vm0, %v7072_v58  ;;  %5200 = vmatpush3.xpose.msk.msra.mxu1 %vm146_vm0, %v7077_v2  ;;  %v4440_v58 = vld [vmem:[%s7967_s0 + $0xc9] sm:$0xff]  ;;  %v4472_v2 = vld [vmem:[%s7967_s0 + $0x279] sm:$0xff] }
 0x1c4   :  { %5167 = vmatprep.subr.msk.mxu0 %vm146_vm0, %v4457_v0  ;;  %5201 = vmatprep.subr.msk.mxu1 %vm146_vm0, %v4489_v7  ;;  %v4609_v0 = vld [vmem:[%s7967_s0 + $0x2c2] sm:$0xff]  ;;  %v4561_v7 = vld [vmem:[%s7967_s0 + $0x52] sm:$0xff] }
 0x1c5   :  { %5197 = vmatprep.mubr.msk.f32.mxu0 %vm146_vm0, %v7560_v63  ;;  %5231 = vmatprep.mubr.msk.f32.mxu1 %vm146_vm0, %v7560_v63 }
 0x1c7   :  { %5168 = vmatpush3.xpose.msk.msra.mxu0 %vm146_vm0, %v7096_v9  ;;  %5202 = vmatpush3.xpose.msk.msra.mxu1 %vm146_vm0, %v7101_v12  ;;  %v4612_v9 = vld [vmem:[%s7967_s0 + $0x2ea] sm:$0xff]  ;;  %v4564_v12 = vld [vmem:[%s7967_s0 + $0x7a] sm:$0xff] }
 0x1c8   :  { %5169 = vmatprep.subr.msk.mxu0 %vm146_vm0, %v6687_v61  ;;  %5203 = vmatprep.subr.msk.mxu1 %vm146_vm0, %v6692_v1  ;;  %v4439_v61 = vld [vmem:[%s7967_s0 + $0xc1] sm:$0xff]  ;;  %v4471_v1 = vld [vmem:[%s7967_s0 + $0x271] sm:$0xff] }
 0x1cb   :  { %5170 = vmatpush3.xpose.msk.msra.mxu0 %vm146_vm0, %v4440_v58  ;;  %5204 = vmatpush3.xpose.msk.msra.mxu1 %vm146_vm0, %v4472_v2  ;;  %v4576_v58 = vld [vmem:[%s7967_s0 + $0x10a] sm:$0xff]  ;;  %v4608_v2 = vld [vmem:[%s7967_s0 + $0x2ba] sm:$0xff] }
 0x1cc   :  { %5171 = vmatprep.subr.msk.mxu0 %vm146_vm0, %v6705_v4  ;;  %5205 = vmatprep.subr.msk.mxu1 %vm146_vm0, %v6710_v5  ;;  %v8190_v4 = vld [vmem:[#allocation9_spill] sm:$0xff]  ;;  %v8191_v5 = vld [vmem:[#allocation10_spill] sm:$0xff] }
 0x1cf   :  { %5172 = vmatpush3.xpose.msk.msra.mxu0 %vm146_vm0, %v4439_v61  ;;  %5206 = vmatpush3.xpose.msk.msra.mxu1 %vm146_vm0, %v4471_v1  ;;  %v4560_v61 = vld [vmem:[%s7967_s0 + $0x4a] sm:$0xff]  ;;  %v4592_v1 = vld [vmem:[%s7967_s0 + $0x1fa] sm:$0xff] }
 0x1d0   :  { %5173 = vmatprep.subr.msk.mxu0 %vm146_vm0, %v6732_v10  ;;  %5207 = vmatprep.subr.msk.mxu1 %vm146_vm0, %v6737_v11  ;;  %v8192_v10 = vld [vmem:[#allocation11_spill] sm:$0xff]  ;;  %v4589_v11 = vld [vmem:[%s7967_s0 + $0x1a2] sm:$0xff] }
 0x1d3   :  { %5174 = vmatpush3.xpose.msk.msra.mxu0 %vm146_vm0, %v6754_v14  ;;  %5208 = vmatpush3.xpose.msk.msra.mxu1 %vm146_vm0, %v6759_v15  ;;  %v4621_v14 = vld [vmem:[%s7967_s0 + $0x352] sm:$0xff]  ;;  %v8193_v15 = vld [vmem:[#allocation5_spill] sm:$0xff] }
 0x1d4   :  { %5175 = vmatprep.subr.msk.mxu0 %vm146_vm0, %v6764_v16  ;;  %5209 = vmatprep.subr.msk.mxu1 %vm146_vm0, %v6769_v17  ;;  %v8194_v16 = vld [vmem:[#allocation6_spill] sm:$0xff] }
 0x1d5   :  { %v4573_v17 = vld [vmem:[%s7967_s0 + $0xe2] sm:$0xff] }
 0x1d7   :  { %5176 = vmatpush3.xpose.msk.msra.mxu0 %vm146_vm0, %v6782_v18  ;;  %5210 = vmatpush3.xpose.msk.msra.mxu1 %vm146_vm0, %v6787_v19  ;;  %v4605_v18 = vld [vmem:[%s7967_s0 + $0x292] sm:$0xff]  ;;  %v4588_v19 = vld [vmem:[%s7967_s0 + $0x19a] sm:$0xff] }
 0x1d8   :  { %5177 = vmatprep.subr.msk.mxu0 %vm146_vm0, %v6792_v20  ;;  %5211 = vmatprep.subr.msk.mxu1 %vm146_vm0, %v6797_v21  ;;  %v4620_v20 = vld [vmem:[%s7967_s0 + $0x34a] sm:$0xff]  ;;  %v7723_v21 = vld [vmem:[%s7968_s1 + $0x40] sm:$0xff] }
 0x1db   :  { %5178 = vmatpush3.xpose.msk.msra.mxu0 %vm146_vm0, %v6810_v22  ;;  %5212 = vmatpush3.xpose.msk.msra.mxu1 %vm146_vm0, %v6815_v23  ;;  %v4572_v22 = vld [vmem:[%s7967_s0 + $0xda] sm:$0xff]  ;;  %v4604_v23 = vld [vmem:[%s7967_s0 + $0x28a] sm:$0xff] }
 0x1dc   :  { %5179 = vmatprep.subr.msk.mxu0 %vm146_vm0, %v6820_v24  ;;  %5213 = vmatprep.subr.msk.mxu1 %vm146_vm0, %v6825_v25  ;;  %v5328_v24 = vmov 0   ;;  %v3672_v25 = vld [vmem:[%s7969_s2] sm:$0xff] }
 0x1dd   :  { %5305 = vset.pattern.permute.xlu0 %v5328_v24 }
 0x1de   :  { %3675 = vperm.xlu0 %5305, %v3672_v25  }
 0x1df   :  { %5180 = vmatpush3.xpose.msk.msra.mxu0 %vm146_vm0, %v6838_v26  ;;  %5214 = vmatpush3.xpose.msk.msra.mxu1 %vm146_vm0, %v6843_v27  ;;  %v8195_v26 = vld [vmem:[#allocation7_spill] sm:$0xff]  ;;  %v8196_v27 = vld [vmem:[#allocation8_spill] sm:$0xff] }
 0x1e0   :  { %5181 = vmatprep.subr.msk.mxu0 %vm146_vm0, %v6848_v28  ;;  %5215 = vmatprep.subr.msk.mxu1 %vm146_vm0, %v6853_v29  ;;  %v4571_v28 = vld [vmem:[%s7967_s0 + $0xca] sm:$0xff]  ;;  %v4603_v29 = vld [vmem:[%s7967_s0 + $0x27a] sm:$0xff] }
 0x1e3   :  { %5182 = vmatpush3.xpose.msk.msra.mxu0 %vm146_vm0, %v6866_v30  ;;  %5216 = vmatpush3.xpose.msk.msra.mxu1 %vm146_vm0, %v6871_v31  ;;  %v8197_v30 = vld [vmem:[#allocation72_spill] sm:$0xff]  ;;  %v8198_v31 = vld [vmem:[#allocation73_spill] sm:$0xff] }
 0x1e4   :  { %5183 = vmatprep.subr.msk.mxu0 %vm146_vm0, %v6876_v32  ;;  %5217 = vmatprep.subr.msk.mxu1 %vm146_vm0, %v6881_v33  ;;  %v4570_v32 = vld [vmem:[%s7967_s0 + $0xc2] sm:$0xff]  ;;  %v4602_v33 = vld [vmem:[%s7967_s0 + $0x272] sm:$0xff] }
 0x1e7   :  { %5184 = vmatpush3.xpose.msk.msra.mxu0 %vm146_vm0, %v6894_v34  ;;  %5218 = vmatpush3.xpose.msk.msra.mxu1 %vm146_vm0, %v6899_v35  ;;  %v4585_v34 = vld [vmem:[%s7967_s0 + $0x172] sm:$0xff]  ;;  %v4617_v35 = vld [vmem:[%s7967_s0 + $0x322] sm:$0xff] }
 0x1e8   :  { %5185 = vmatprep.subr.msk.mxu0 %vm146_vm0, %v6904_v36  ;;  %5219 = vmatprep.subr.msk.mxu1 %vm146_vm0, %v6909_v37  ;;  %v4569_v36 = vld [vmem:[%s7967_s0 + $0xb2] sm:$0xff]  ;;  %v4601_v37 = vld [vmem:[%s7967_s0 + $0x262] sm:$0xff] }
 0x1eb   :  { %5186 = vmatpush3.xpose.msk.msra.mxu0 %vm146_vm0, %v6922_v38  ;;  %5220 = vmatpush3.xpose.msk.msra.mxu1 %vm146_vm0, %v6927_v39  ;;  %v4584_v38 = vld [vmem:[%s7967_s0 + $0x16a] sm:$0xff]  ;;  %v4616_v39 = vld [vmem:[%s7967_s0 + $0x31a] sm:$0xff] }
 0x1ec   :  { %5187 = vmatprep.subr.msk.mxu0 %vm146_vm0, %v6932_v40  ;;  %5221 = vmatprep.subr.msk.mxu1 %vm146_vm0, %v6937_v41  ;;  %v4568_v40 = vld [vmem:[%s7967_s0 + $0xaa] sm:$0xff]  ;;  %v4600_v41 = vld [vmem:[%s7967_s0 + $0x25a] sm:$0xff] }
 0x1ef   :  { %5188 = vmatpush3.xpose.msk.msra.mxu0 %vm146_vm0, %v6950_v42  ;;  %5222 = vmatpush3.xpose.msk.msra.mxu1 %vm146_vm0, %v6955_v43  ;;  %v4583_v42 = vld [vmem:[%s7967_s0 + $0x15a] sm:$0xff]  ;;  %v4615_v43 = vld [vmem:[%s7967_s0 + $0x30a] sm:$0xff] }
 0x1f0   :  { %5189 = vmatprep.subr.msk.mxu0 %vm146_vm0, %v6960_v44  ;;  %5223 = vmatprep.subr.msk.mxu1 %vm146_vm0, %v6965_v45  ;;  %v4567_v44 = vld [vmem:[%s7967_s0 + $0x9a] sm:$0xff]  ;;  %v4599_v45 = vld [vmem:[%s7967_s0 + $0x24a] sm:$0xff] }
 0x1f3   :  { %5190 = vmatpush3.xpose.msk.msra.mxu0 %vm146_vm0, %v6978_v46  ;;  %5224 = vmatpush3.xpose.msk.msra.mxu1 %vm146_vm0, %v6983_v47  ;;  %v4582_v46 = vld [vmem:[%s7967_s0 + $0x152] sm:$0xff]  ;;  %v4614_v47 = vld [vmem:[%s7967_s0 + $0x302] sm:$0xff] }
 0x1f4   :  { %5191 = vmatprep.subr.msk.mxu0 %vm146_vm0, %v6988_v48  ;;  %5225 = vmatprep.subr.msk.mxu1 %vm146_vm0, %v6993_v49  ;;  %v4566_v48 = vld [vmem:[%s7967_s0 + $0x92] sm:$0xff]  ;;  %v4598_v49 = vld [vmem:[%s7967_s0 + $0x242] sm:$0xff] }
 0x1f7   :  { %5192 = vmatpush3.xpose.msk.msra.mxu0 %vm146_vm0, %v7006_v50  ;;  %5226 = vmatpush3.xpose.msk.msra.mxu1 %vm146_vm0, %v7011_v51  ;;  %v4581_v50 = vld [vmem:[%s7967_s0 + $0x142] sm:$0xff]  ;;  %v4613_v51 = vld [vmem:[%s7967_s0 + $0x2f2] sm:$0xff] }
 0x1f8   :  { %5193 = vmatprep.subr.msk.mxu0 %vm146_vm0, %v7016_v52  ;;  %5227 = vmatprep.subr.msk.mxu1 %vm146_vm0, %v7021_v53  ;;  %v4565_v52 = vld [vmem:[%s7967_s0 + $0x82] sm:$0xff]  ;;  %v4597_v53 = vld [vmem:[%s7967_s0 + $0x232] sm:$0xff] }
 0x1fb   :  { %5194 = vmatpush3.xpose.msk.msra.mxu0 %vm146_vm0, %v7034_v54  ;;  %5228 = vmatpush3.xpose.msk.msra.mxu1 %vm146_vm0, %v8190_v4  ;;  %v4580_v54 = vld [vmem:[%s7967_s0 + $0x13a] sm:$0xff] }
 0x1fc   :  { %5195 = vmatprep.subr.msk.mxu0 %vm146_vm0, %v8191_v5  ;;  %5229 = vmatprep.subr.msk.mxu1 %vm146_vm0, %v8192_v10  ;;  %v4575_v4 = vld [vmem:[%s7967_s0 + $0xfa] sm:$0xff]  ;;  %v4607_v5 = vld [vmem:[%s7967_s0 + $0x2aa] sm:$0xff] }
 0x1fd   :  { %v4559_v10 = vld [vmem:[%s7967_s0 + $0x3a] sm:$0xff] }
 0x1ff   :  { %5196 = vmatpush3.xpose.msk.msra.mxu0 %vm146_vm0, %v8193_v15  ;;  %5230 = vmatpush3.xpose.msk.msra.mxu1 %vm146_vm0, %v8194_v16  ;;  %v4606_v15 = vld [vmem:[%s7967_s0 + $0x2a2] sm:$0xff]  ;;  %v4558_v16 = vld [vmem:[%s7967_s0 + $0x32] sm:$0xff] }
 0x200   :  { %5233 = vmatprep.subr.msk.mxu0 %vm146_vm0, %v4589_v11  ;;  %5267 = vmatprep.subr.msk.mxu1 %vm146_vm0, %v4621_v14  ;;  %v4591_v11 = vld [vmem:[%s7967_s0 + $0x1ea] sm:$0xff]  ;;  %v4574_v14 = vld [vmem:[%s7967_s0 + $0xf2] sm:$0xff] }
 0x202   :  { %5198 = vmatmul.mubr.msk.f32.vlgmr.msra.gmra.mxu0 %vm146_vm0, %v7560_v63  ;;  %5232 = vmatmul.mubr.msk.f32.vlgmr.msra.gmra.mxu1 %vm146_vm0, %v7560_v63  ;;  %v4593_v63 = vld [vmem:[%s7967_s0 + $0x202] sm:$0xff] }
 0x203   :  { %5234 = vmatpush3.xpose.msk.msra.mxu0 %vm146_vm0, %v4573_v17  ;;  %5268 = vmatpush3.xpose.msk.msra.mxu1 %vm146_vm0, %v4605_v18  ;;  %v4590_v17 = vld [vmem:[%s7967_s0 + $0x1e2] sm:$0xff]  ;;  %v408_v18 = vpop.f32.mrf.mxu0  ;;  %s5329_s0 = smov [#allocation2]  }
 0x204   :  { %5235 = vmatprep.subr.msk.mxu0 %vm146_vm0, %v4588_v19  ;;  %5269 = vmatprep.subr.msk.mxu1 %vm146_vm0, %v4620_v20  ;;  %v479_v19 = vpop.f32.mrf.mxu1  ;;  %s3692_s17 = sshll.u32 %s5329_s0, 4  ;;  %s3693_s17 = int_to_ptr.vmem [resolvable:$true] %s3692_s17 }
 0x205   :  { %5265 = vmatprep.mubr.msk.f32.mxu0 %vm146_vm0, %v7723_v21  ;;  %5299 = vmatprep.mubr.msk.f32.mxu1 %vm146_vm0, %v7723_v21  ;;  %v410_v20 = vpop.f32.mrf.mxu0  ;;  %s5306_s18 = scalar_lea.vmem %s3693_s17, 512  ;;  %p5311_p1 = scmp.lt.s32.totalorder %s3693_s17, %s3693_s17 }
 0x206   :  { %p5307_p0 = scmp.ne.s32.totalorder %s3693_s17, %s5306_s18  ;;  %p5312_p2 = scmp.lt.s32.totalorder %s5306_s18, %s5306_s18 }
 0x207   :  { %5236 = vmatpush3.xpose.msk.msra.mxu0 %vm146_vm0, %v4572_v22  ;;  %5270 = vmatpush3.xpose.msk.msra.mxu1 %vm146_vm0, %v4604_v23  ;;  %v481_v22 = vpop.f32.mrf.mxu1  ;;  %v745_v23 = vpop.f32.mrf.mxu0 }
 0x208   :  { %5237 = vmatprep.subr.msk.mxu0 %vm146_vm0, %v8195_v26  ;;  %5271 = vmatprep.subr.msk.mxu1 %vm146_vm0, %v8196_v27  ;;  %p5313_p3 = por %p5312_p2, %p5311_p1 }
 0x209   :  { %v816_v24 = vpop.f32.mrf.mxu1  ;;  %v747_v25 = vpop.f32.mrf.mxu0 }
 0x20a   :  { %p5314_p4 = pnand %p5313_p3, %p5307_p0 }
 0x20b   :  { %5238 = vmatpush3.xpose.msk.msra.mxu0 %vm146_vm0, %v4571_v28  ;;  %5272 = vmatpush3.xpose.msk.msra.mxu1 %vm146_vm0, %v4603_v29  ;;  %v818_v26 = vpop.f32.mrf.mxu1  ;;  %v1148_v27 = vpop.f32.mrf.mxu0 }
 0x20c   :  { %5239 = vmatprep.subr.msk.mxu0 %vm146_vm0, %v8197_v30  ;;  %5273 = vmatprep.subr.msk.mxu1 %vm146_vm0, %v8198_v31 }
 0x20d   :  { %v1219_v28 = vpop.f32.mrf.mxu1  ;;  %v1150_v29 = vpop.f32.mrf.mxu0 }
 0x20f   :  { %5240 = vmatpush3.xpose.msk.msra.mxu0 %vm146_vm0, %v4570_v32  ;;  %5274 = vmatpush3.xpose.msk.msra.mxu1 %vm146_vm0, %v4602_v33  ;;  %v1221_v30 = vpop.f32.mrf.mxu1  ;;  %v1556_v31 = vpop.f32.mrf.mxu0 }
 0x210   :  { %5241 = vmatprep.subr.msk.mxu0 %vm146_vm0, %v4585_v34  ;;  %5275 = vmatprep.subr.msk.mxu1 %vm146_vm0, %v4617_v35 }
 0x211   :  { %v1627_v32 = vpop.f32.mrf.mxu1  ;;  %v1558_v33 = vpop.f32.mrf.mxu0 }
 0x213   :  { %5242 = vmatpush3.xpose.msk.msra.mxu0 %vm146_vm0, %v4569_v36  ;;  %5276 = vmatpush3.xpose.msk.msra.mxu1 %vm146_vm0, %v4601_v37  ;;  %v1629_v34 = vpop.f32.mrf.mxu1  ;;  %v1963_v35 = vpop.f32.mrf.mxu0 }
 0x214   :  { %5243 = vmatprep.subr.msk.mxu0 %vm146_vm0, %v4584_v38  ;;  %5277 = vmatprep.subr.msk.mxu1 %vm146_vm0, %v4616_v39 }
 0x215   :  { %v2034_v36 = vpop.f32.mrf.mxu1  ;;  %v1965_v37 = vpop.f32.mrf.mxu0 }
 0x217   :  { %5244 = vmatpush3.xpose.msk.msra.mxu0 %vm146_vm0, %v4568_v40  ;;  %5278 = vmatpush3.xpose.msk.msra.mxu1 %vm146_vm0, %v4600_v41 }
 0x218   :  { %5245 = vmatprep.subr.msk.mxu0 %vm146_vm0, %v4583_v42  ;;  %5279 = vmatprep.subr.msk.mxu1 %vm146_vm0, %v4615_v43  ;;  %v746_v42 = vadd.f32 %v745_v23, %v408_v18  ;;  %v817_v43 = vadd.f32 %v816_v24, %v479_v19 }
 0x21b   :  { %5246 = vmatpush3.xpose.msk.msra.mxu0 %vm146_vm0, %v4567_v44  ;;  %5280 = vmatpush3.xpose.msk.msra.mxu1 %vm146_vm0, %v4599_v45 }
 0x21c   :  { %5247 = vmatprep.subr.msk.mxu0 %vm146_vm0, %v4582_v46  ;;  %5281 = vmatprep.subr.msk.mxu1 %vm146_vm0, %v4614_v47  ;;  %v748_v46 = vadd.f32 %v747_v25, %v410_v20  ;;  %v819_v47 = vadd.f32 %v818_v26, %v481_v22 }
 0x21f   :  { %5248 = vmatpush3.xpose.msk.msra.mxu0 %vm146_vm0, %v4566_v48  ;;  %5282 = vmatpush3.xpose.msk.msra.mxu1 %vm146_vm0, %v4598_v49  ;;  %v1224_v48 = vadd.f32 %v1148_v27, %v746_v42  ;;  %v1226_v49 = vadd.f32 %v1219_v28, %v817_v43 }
 0x220   :  { %5249 = vmatprep.subr.msk.mxu0 %vm146_vm0, %v4581_v50  ;;  %5283 = vmatprep.subr.msk.mxu1 %vm146_vm0, %v4613_v51  ;;  %v1225_v50 = vadd.f32 %v1150_v29, %v748_v46  ;;  %v1227_v51 = vadd.f32 %v1221_v30, %v819_v47 }
 0x223   :  { %5250 = vmatpush3.xpose.msk.msra.mxu0 %vm146_vm0, %v4565_v52  ;;  %5284 = vmatpush3.xpose.msk.msra.mxu1 %vm146_vm0, %v4597_v53  ;;  %v1632_v52 = vadd.f32 %v1556_v31, %v1224_v48  ;;  %v1634_v53 = vadd.f32 %v1627_v32, %v1226_v49 }
 0x224   :  { %5251 = vmatprep.subr.msk.mxu0 %vm146_vm0, %v4580_v54  ;;  %5285 = vmatprep.subr.msk.mxu1 %vm146_vm0, %v4612_v9 }
 0x227   :  { %5252 = vmatpush3.xpose.msk.msra.mxu0 %vm146_vm0, %v4564_v12  ;;  %5286 = vmatpush3.xpose.msk.msra.mxu1 %vm146_vm0, %v4596_v6  ;;  %v1633_v12 = vadd.f32 %v1558_v33, %v1225_v50  ;;  %v1635_v6 = vadd.f32 %v1629_v34, %v1227_v51 }
 0x228   :  { %5253 = vmatprep.subr.msk.mxu0 %vm146_vm0, %v4579_v60  ;;  %5287 = vmatprep.subr.msk.mxu1 %vm146_vm0, %v4611_v3  ;;  %v2039_v60 = vadd.f32 %v1963_v35, %v1632_v52  ;;  %v2041_v3 = vadd.f32 %v2034_v36, %v1634_v53 }
 0x22b   :  { %5254 = vmatpush3.xpose.msk.msra.mxu0 %vm146_vm0, %v4563_v55  ;;  %5288 = vmatpush3.xpose.msk.msra.mxu1 %vm146_vm0, %v4595_v13 }
 0x22c   :  { %5255 = vmatprep.subr.msk.mxu0 %vm146_vm0, %v4578_v8  ;;  %5289 = vmatprep.subr.msk.mxu1 %vm146_vm0, %v4610_v59  ;;  %v2040_v8 = vadd.f32 %v1965_v37, %v1633_v12 }
 0x22f   :  { %5256 = vmatpush3.xpose.msk.msra.mxu0 %vm146_vm0, %v4562_v56  ;;  %5290 = vmatpush3.xpose.msk.msra.mxu1 %vm146_vm0, %v4594_v57 }
 0x230   :  { %5257 = vmatprep.subr.msk.mxu0 %vm146_vm0, %v4577_v62  ;;  %5291 = vmatprep.subr.msk.mxu1 %vm146_vm0, %v4609_v0 }
 0x233   :  { %5258 = vmatpush3.xpose.msk.msra.mxu0 %vm146_vm0, %v4561_v7  ;;  %5292 = vmatpush3.xpose.msk.msra.mxu1 %vm146_vm0, %v4593_v63 }
 0x234   :  { %5259 = vmatprep.subr.msk.mxu0 %vm146_vm0, %v4576_v58  ;;  %5293 = vmatprep.subr.msk.mxu1 %vm146_vm0, %v4608_v2 }
 0x237   :  { %5260 = vmatpush3.xpose.msk.msra.mxu0 %vm146_vm0, %v4560_v61  ;;  %5294 = vmatpush3.xpose.msk.msra.mxu1 %vm146_vm0, %v4592_v1 }
 0x238   :  { %5261 = vmatprep.subr.msk.mxu0 %vm146_vm0, %v4575_v4  ;;  %5295 = vmatprep.subr.msk.mxu1 %vm146_vm0, %v4607_v5 }
 0x23b   :  { %5262 = vmatpush3.xpose.msk.msra.mxu0 %vm146_vm0, %v4559_v10  ;;  %5296 = vmatpush3.xpose.msk.msra.mxu1 %vm146_vm0, %v4591_v11 }
 0x23c   :  { %5263 = vmatprep.subr.msk.mxu0 %vm146_vm0, %v4574_v14  ;;  %5297 = vmatprep.subr.msk.mxu1 %vm146_vm0, %v4606_v15 }
 0x23f   :  { %5264 = vmatpush3.xpose.msk.msra.mxu0 %vm146_vm0, %v4558_v16  ;;  %5298 = vmatpush3.xpose.msk.msra.mxu1 %vm146_vm0, %v4590_v17 }
 0x242   :  { %5266 = vmatmul.mubr.msk.f32.vlgmr.msra.gmra.mxu0 %vm146_vm0, %v7723_v21  ;;  %5300 = vmatmul.mubr.msk.f32.vlgmr.msra.gmra.mxu1 %vm146_vm0, %v7723_v21  ;;  %v2036_v21 = vpop.f32.mrf.mxu1  ;;  %v2370_v38 = vpop.f32.mrf.mxu0 }
 0x243   :  { %v2042_v59 = vadd.f32 %v2036_v21, %v1635_v6  ;;  %v2446_v56 = vadd.f32 %v2370_v38, %v2039_v60 }
 0x244   :  { %v2441_v39 = vpop.f32.mrf.mxu1  ;;  %v2372_v40 = vpop.f32.mrf.mxu0 }
 0x245   :  { %v2448_v57 = vadd.f32 %v2441_v39, %v2041_v3  ;;  %v2447_v62 = vadd.f32 %v2372_v40, %v2040_v8 }
 0x246   :  { %v2443_v41 = vpop.f32.mrf.mxu1 }
 0x247   :  { %v2449_v0 = vadd.f32 %v2443_v41, %v2042_v59 }
 0x259   :  { %v3676_v10 = vpop.permute.xlu0 %3675 }
 0x282   :  { %v2778_v44 = vpop.f32.mrf.mxu0  ;;  %v2849_v45 = vpop.f32.mrf.mxu1 }
 0x283   :  { %v2854_v7 = vadd.f32 %v2778_v44, %v2446_v56  ;;  %v2856_v63 = vadd.f32 %v2849_v45, %v2448_v57 }
 0x284   :  { %v2780_v54 = vpop.f32.mrf.mxu0  ;;  %v2851_v9 = vpop.f32.mrf.mxu1 }
 0x285   :  { %v2855_v61 = vadd.f32 %v2780_v54, %v2447_v62  ;;  %v2857_v1 = vadd.f32 %v2851_v9, %v2449_v0 }
 0x2c2   :  { %v3185_v55 = vpop.f32.mrf.mxu0  ;;  %v3256_v13 = vpop.f32.mrf.mxu1 }
 0x2c3   :  { %v3261_v4 = vadd.f32 %v3185_v55, %v2854_v7  ;;  %v3263_v5 = vadd.f32 %v3256_v13, %v2856_v63 }
 0x2c4   :  { %v3187_v58 = vpop.f32.mrf.mxu0  ;;  %v3258_v2 = vpop.f32.mrf.mxu1 }
 0x2c5   :  { %v3262_v15 = vadd.f32 %v3187_v58, %v2855_v61  ;;  %v3264_v16 = vadd.f32 %v3258_v2, %v2857_v1 }
 0x302   :  { %v3592_v11 = vpop.f32.mrf.mxu0  ;;  %v3663_v14 = vpop.f32.mrf.mxu1 }
 0x303   :  { %v3668_v17 = vadd.f32 %v3592_v11, %v3261_v4  ;;  %v3670_v18 = vadd.f32 %v3663_v14, %v3263_v5 }
 0x304   :  { %v3594_v19 = vpop.f32.mrf.mxu0  ;;  %v3665_v20 = vpop.f32.mrf.mxu1 }
 0x305   :  { %v3678_v22 = vadd.f32 %v3676_v10, %v3668_v17  ;;  %v3680_v23 = vadd.f32 %v3676_v10, %v3670_v18  ;;  %v3669_v24 = vadd.f32 %v3594_v19, %v3262_v15  ;;  %v3671_v25 = vadd.f32 %v3665_v20, %v3264_v16 }
 0x307   :  { %3682 = vst [vmem:[#allocation2] sm:$0xff] %v3678_v22  ;;  %3685 = vst [vmem:[#allocation2 + $0x10] sm:$0xff] %v3680_v23  ;;  %v3679_v26 = vadd.f32 %v3676_v10, %v3669_v24  ;;  %v3681_v27 = vadd.f32 %v3676_v10, %v3671_v25 }
 0x309   :  { %3683 = vst [vmem:[#allocation2 + $0x8] sm:$0xff] %v3679_v26  ;;  %3686 = vst [vmem:[#allocation2 + $0x18] sm:$0xff] %v3681_v27 }
 0x30a   :  { %5317 = shalt.err (!%p5314_p4)
}
 0x30b   :  { %s5330_s19 = smov 256   ;;  %s5331_s20 = smov 16  }
 0x30c   :  { %3698 = dma.vmem_to_hbm [thread:$0]  %s3693_s17, 512, %s7970_s3, [#allocation3], %s5330_s19, %s5330_s19, %s5331_s20  }
 0x30d   :  { %5326 = dma.done.wait [#allocation3], 512  }
 0x30e   :  { %5327 = vsyncadd [#allocation3], 4294966784 }
 0x30f   :  { %3702 = vsyncpa [#allocation3], 1 }

</bundles_post_ra>
